<compile_context>
chip_gen: v6e
topology: v6e:2x2x1
jax: 0.10.0
libtpu: 0.0.40
codegen_flags: <defaults>
</compile_context>

<pallas_src>
import functools
import math
from types import SimpleNamespace

import jax
import jax.numpy as jnp
from jax.experimental import pallas as pl
from jax.experimental.pallas import tpu as pltpu


# ---------------------------------------------------------------------------
# small helpers
# ---------------------------------------------------------------------------

def _round_up(x, m):
    return ((x + m - 1) // m) * m


def _pick_tile(dim, target, align):
    """Largest multiple of `align` dividing `dim` and <= target; else full dim
    (full-dim blocks are always layout-legal)."""
    if dim <= target:
        return dim
    t = (target // align) * align
    while t >= align:
        if dim % t == 0:
            return t
        t -= align
    return dim


def _erf(x):
    # Abramowitz & Stegun 7.1.26 (|err| < 1.5e-7): only mul/add/exp/select,
    # which all lower cleanly in Mosaic (VPU + EUP).
    a1, a2, a3 = 0.254829592, -0.284496736, 1.421413741
    a4, a5, p = -1.453152027, 1.061405429, 0.3275911
    sgn = jnp.where(x >= 0.0, 1.0, -1.0)
    z = jnp.abs(x)
    t = 1.0 / (1.0 + p * z)
    poly = ((((a5 * t + a4) * t + a3) * t + a2) * t + a1) * t
    return sgn * (1.0 - poly * jnp.exp(-z * z))


def _gelu(x):
    # HuggingFace exact gelu: x * 0.5 * (1 + erf(x / sqrt(2)))
    return x * 0.5 * (1.0 + _erf(x * (1.0 / math.sqrt(2.0))))


def _ln_core(x, gamma, beta, eps):
    # TF-style LayerNorm (epsilon inside the sqrt), biased variance.
    u = jnp.mean(x, axis=-1, keepdims=True)
    d = x - u
    s = jnp.mean(d * d, axis=-1, keepdims=True)
    return gamma * (d * jax.lax.rsqrt(s + eps)) + beta


# ---------------------------------------------------------------------------
# Pallas kernels
# ---------------------------------------------------------------------------

def _linear_kernel(x_ref, w_ref, b_ref, o_ref, *, activation):
    """One (tm, tn) output tile:  act(x @ W + b), bf16 MXU, f32 accumulate."""
    x = x_ref[...].astype(jnp.bfloat16)            # MXU-native dtype
    acc = jnp.dot(x, w_ref[...], preferred_element_type=jnp.float32)
    acc = acc + b_ref[...]                         # (1, tn) f32 bias row
    if activation == "gelu":
        acc = _gelu(acc)
    o_ref[...] = acc.astype(o_ref.dtype)


def _norm_kernel(x_ref, g_ref, b_ref, o_ref, *, eps):
    o_ref[...] = _ln_core(x_ref[...], g_ref[...], b_ref[...], eps).astype(o_ref.dtype)


def _add_norm_kernel(a_ref, r_ref, g_ref, b_ref, o_ref, *, eps):
    x = a_ref[...] + r_ref[...]                    # fused residual add
    o_ref[...] = _ln_core(x, g_ref[...], b_ref[...], eps).astype(o_ref.dtype)


def _attention_kernel(q_ref, k_ref, v_ref, o_ref, *, scale):
    """One (batch, head) per grid step: softmax(q k^T / sqrt(W)) v."""
    q = q_ref[0]                                   # (S, W)
    k = k_ref[0]
    v = v_ref[0]
    s = jax.lax.dot_general(q, k, (((1,), (1,)), ((), ())),
                            preferred_element_type=jnp.float32) * scale
    s = s - jnp.max(s, axis=-1, keepdims=True)
    p = jnp.exp(s)
    p = p / jnp.sum(p, axis=-1, keepdims=True)
    o_ref[0] = jnp.dot(p, v, preferred_element_type=jnp.float32).astype(o_ref.dtype)


# ---------------------------------------------------------------------------
# wrappers (pallas_call plumbing)
# ---------------------------------------------------------------------------

def linear(x2, w, b, *, activation=None, tm_target=256, tn_target=512):
    """x2: (M, K) f32;  w: (K, N) bf16 (pre-transposed);  b: (1, N) f32."""
    M, K = x2.shape
    Kw, N = w.shape
    assert K == Kw
    tm = min(tm_target, _round_up(M, 8))
    M_pad = _round_up(M, tm)
    if M_pad != M:
        x2 = jnp.pad(x2, ((0, M_pad - M), (0, 0)))
    tn = _pick_tile(N, tn_target, 128)

    out = pl.pallas_call(
        functools.partial(_linear_kernel, activation=activation),
        out_shape=jax.ShapeDtypeStruct((M_pad, N), jnp.float32),
        grid_spec=pltpu.PrefetchScalarGridSpec(
            num_scalar_prefetch=0,
            grid=(M_pad // tm, N // tn),
            in_specs=[
                pl.BlockSpec((tm, K), lambda i, j: (i, 0)),
                pl.BlockSpec((K, tn), lambda i, j: (0, j)),
                pl.BlockSpec((1, tn), lambda i, j: (0, j)),
            ],
            out_specs=pl.BlockSpec((tm, tn), lambda i, j: (i, j)),
        ),
        compiler_params=pltpu.CompilerParams(
            dimension_semantics=("parallel", "parallel"),
            vmem_limit_bytes=48 * 1024 * 1024,
        ),
    )(x2, w, b)
    return out[:M] if M_pad != M else out


def _rowwise_norm_call(kernel, arrays, gamma, beta, *, eps, tm_target=256):
    M, D = arrays[0].shape
    tm = min(tm_target, _round_up(M, 8))
    M_pad = _round_up(M, tm)
    if M_pad != M:
        arrays = [jnp.pad(a, ((0, M_pad - M), (0, 0))) for a in arrays]
    row = pl.BlockSpec((tm, D), lambda i: (i, 0))
    vec = pl.BlockSpec((1, D), lambda i: (0, 0))
    out = pl.pallas_call(
        functools.partial(kernel, eps=eps),
        out_shape=jax.ShapeDtypeStruct((M_pad, D), jnp.float32),
        grid_spec=pltpu.PrefetchScalarGridSpec(
            num_scalar_prefetch=0,
            grid=(M_pad // tm,),
            in_specs=[row] * len(arrays) + [vec, vec],
            out_specs=row,
        ),
        compiler_params=pltpu.CompilerParams(dimension_semantics=("parallel",)),
    )(*arrays, gamma, beta)
    return out[:M] if M_pad != M else out


def layernorm(x2, gamma, beta, *, eps=1e-12):
    return _rowwise_norm_call(_norm_kernel, [x2], gamma, beta, eps=eps)


def add_layernorm(x2, r2, gamma, beta, *, eps=1e-12):
    return _rowwise_norm_call(_add_norm_kernel, [x2, r2], gamma, beta, eps=eps)


def attention_core(q3, k3, v3, *, scale):
    """q3/k3/v3: (B*H, S, W) f32 -> (B*H, S, W) attention output."""
    # TODO(synk): the torch module also caches the attention probs in
    #             self.scores (module side-state); not materialized here.
    BH, S, W = q3.shape
    blk = pl.BlockSpec((1, S, W), lambda i: (i, 0, 0))
    return pl.pallas_call(
        functools.partial(_attention_kernel, scale=scale),
        out_shape=jax.ShapeDtypeStruct((BH, S, W), jnp.float32),
        grid_spec=pltpu.PrefetchScalarGridSpec(
            num_scalar_prefetch=0,
            grid=(BH,),
            in_specs=[blk, blk, blk],
            out_specs=blk,
        ),
        compiler_params=pltpu.CompilerParams(dimension_semantics=("parallel",)),
    )(q3, k3, v3)


# ---------------------------------------------------------------------------
# full Transformer forward (Pallas path)
# ---------------------------------------------------------------------------

def transformer_forward_pallas(params, x, *, n_layers, n_heads, emb_norm, eps=1e-12):
    B, S, Fi = x.shape
    D = params["w_e"].shape[1]
    H = n_heads
    W = D // H
    M = B * S
    scale = 1.0 / math.sqrt(W)

    # ---- Embeddings: lin -> (norm) -> +pos -> norm
    x2 = x.reshape(M, Fi)
    e = linear(x2, params["w_e"], params["b_e"])
    if emb_norm:
        e = layernorm(e, params["g_emb"], params["b_emb"], eps=eps)
    pos = jnp.broadcast_to(params["pos"][None, :S, :], (B, S, D)).reshape(M, D)
    h = add_layernorm(e, pos, params["g_emb"], params["b_emb"], eps=eps)

    # ---- blocks (weights shared across layers, as in the torch module)
    for _ in range(n_layers):
        # fused q/k/v projection: one (D, 3D) matmul
        qkv = linear(h, params["w_qkv"], params["b_qkv"])
        q, k, v = jnp.split(qkv, 3, axis=-1)

        def to_heads(t):
            return t.reshape(B, S, H, W).transpose(0, 2, 1, 3).reshape(B * H, S, W)

        o = attention_core(to_heads(q), to_heads(k), to_heads(v), scale=scale)
        h_att = o.reshape(B, H, S, W).transpose(0, 2, 1, 3).reshape(M, D)

        p = linear(h_att, params["w_proj"], params["b_proj"])
        h = add_layernorm(h_att, p, params["g1"], params["b1"], eps=eps)

        f = linear(h, params["w_fc1"], params["b_fc1"], activation="gelu")
        f = linear(f, params["w_fc2"], params["b_fc2"])
        h = add_layernorm(h, f, params["g2"], params["b2"], eps=eps)

    return h.reshape(B, S, D)


# ---------------------------------------------------------------------------
# parameters
# ---------------------------------------------------------------------------

def _init_linear(key, d_out, d_in):
    kw, kb = jax.random.split(key)
    bound = 1.0 / math.sqrt(d_in)
    w = jax.random.uniform(kw, (d_out, d_in), jnp.float32, -bound, bound)
    b = jax.random.uniform(kb, (d_out,), jnp.float32, -bound, bound)
    return w, b


def make_raw_params(key, cfg):
    ks = jax.random.split(key, 11)
    we, be = _init_linear(ks[0], cfg.hidden, cfg.feature_num)
    wq, bq = _init_linear(ks[1], cfg.hidden, cfg.hidden)
    wk, bk = _init_linear(ks[2], cfg.hidden, cfg.hidden)
    wv, bv = _init_linear(ks[3], cfg.hidden, cfg.hidden)
    wp, bp = _init_linear(ks[4], cfg.hidden, cfg.hidden)
    wf1, bf1 = _init_linear(ks[5], cfg.hidden_ff, cfg.hidden)
    wf2, bf2 = _init_linear(ks[6], cfg.hidden, cfg.hidden_ff)
    pos = jax.random.normal(ks[7], (cfg.seq_len, cfg.hidden), jnp.float32)

    def ln_params(k):
        kg, kb = jax.random.split(k)
        g = 1.0 + 0.1 * jax.random.normal(kg, (cfg.hidden,), jnp.float32)
        b = 0.1 * jax.random.normal(kb, (cfg.hidden,), jnp.float32)
        return g, b

    g_emb, b_emb = ln_params(ks[8])
    g1, b1 = ln_params(ks[9])
    g2, b2 = ln_params(ks[10])
    return dict(we=we, be=be, wq=wq, bq=bq, wk=wk, bk=bk, wv=wv, bv=bv,
                wp=wp, bp=bp, wf1=wf1, bf1=bf1, wf2=wf2, bf2=bf2, pos=pos,
                g_emb=g_emb, b_emb=b_emb, g1=g1, b1=b1, g2=g2, b2=b2)


def prep_kernel_params(raw):
    """One-time prep: transpose to (in,out), fuse q/k/v, cast weights to bf16.
    Kept out of the per-call path (perf review: no per-call transposes)."""
    def wt(w):
        return jnp.asarray(w.T, dtype=jnp.bfloat16)

    def row(b):
        return jnp.asarray(b, jnp.float32).reshape(1, -1)

    return dict(
        w_e=wt(raw["we"]), b_e=row(raw["be"]),
        w_qkv=jnp.concatenate([wt(raw["wq"]), wt(raw["wk"]), wt(raw["wv"])], axis=1),
        b_qkv=row(jnp.concatenate([raw["bq"], raw["bk"], raw["bv"]])),
        w_proj=wt(raw["wp"]), b_proj=row(raw["bp"]),
        w_fc1=wt(raw["wf1"]), b_fc1=row(raw["bf1"]),
        w_fc2=wt(raw["wf2"]), b_fc2=row(raw["bf2"]),
        pos=raw["pos"],
        g_emb=row(raw["g_emb"]), b_emb=row(raw["b_emb"]),
        g1=row(raw["g1"]), b1=row(raw["b1"]),
        g2=row(raw["g2"]), b2=row(raw["b2"]),
    )


# ---------------------------------------------------------------------------
# plain-JAX f32 reference (mirrors the PyTorch forward exactly)
# ---------------------------------------------------------------------------

def transformer_forward_ref(raw, x, *, n_layers, n_heads, emb_norm, eps=1e-12):
    def lin(t, w, b):
        return t @ w.T + b

    def ln(t, g, b):
        u = jnp.mean(t, axis=-1, keepdims=True)
        s = jnp.mean((t - u) ** 2, axis=-1, keepdims=True)
        return g * (t - u) / jnp.sqrt(s + eps) + b

    def gelu_exact(t):
        return t * 0.5 * (1.0 + jax.scipy.special.erf(t / math.sqrt(2.0)))

    B, S, _ = x.shape
    D = raw["wq"].shape[0]
    H = n_heads
    Wd = D // H

    e = lin(x, raw["we"], raw["be"])
    if emb_norm:
        e = ln(e, raw["g_emb"], raw["b_emb"])
    e = e + raw["pos"][None, :S, :]
    h = ln(e, raw["g_emb"], raw["b_emb"])

    for _ in range(n_layers):
        q = lin(h, raw["wq"], raw["bq"])
        k = lin(h, raw["wk"], raw["bk"])
        v = lin(h, raw["wv"], raw["bv"])

        def split(t):
            return t.reshape(B, S, H, Wd).transpose(0, 2, 1, 3)

        qh, kh, vh = split(q), split(k), split(v)
        sc = (qh @ kh.transpose(0, 1, 3, 2)) / math.sqrt(Wd)
        p = jax.nn.softmax(sc, axis=-1)
        h = (p @ vh).transpose(0, 2, 1, 3).reshape(B, S, D)
        h = ln(h + lin(h, raw["wp"], raw["bp"]), raw["g1"], raw["b1"])
        ff = lin(gelu_exact(lin(h, raw["wf1"], raw["bf1"])), raw["wf2"], raw["bf2"])
        h = ln(h + ff, raw["g2"], raw["b2"])
    return h


# ---------------------------------------------------------------------------
# main
# ---------------------------------------------------------------------------

if __name__ == "__main__":
    cfg = SimpleNamespace(feature_num=24, hidden=32, hidden_ff=64, seq_len=8,
                          n_heads=4, n_layers=2, emb_norm=True)
    B = 2
    assert cfg.hidden % cfg.n_heads == 0

    key = jax.random.PRNGKey(0)
    k_par, k_x = jax.random.split(key)
    raw = make_raw_params(k_par, cfg)
    kparams = prep_kernel_params(raw)
    x = jax.random.normal(k_x, (B, cfg.seq_len, cfg.feature_num), jnp.float32)

    fwd = jax.jit(functools.partial(transformer_forward_pallas,
                                    n_layers=cfg.n_layers,
                                    n_heads=cfg.n_heads,
                                    emb_norm=cfg.emb_norm))
    out = fwd(kparams, x)
    out = jax.block_until_ready(out)
    assert out.shape == (B, cfg.seq_len, cfg.hidden)

    # correctness vs. f32 reference (bf16 matmuls -> loose relative tolerance)
    ref = transformer_forward_ref(raw, x, n_layers=cfg.n_layers,
                                  n_heads=cfg.n_heads, emb_norm=cfg.emb_norm)
    rel = float(jnp.linalg.norm(out - ref) / jnp.linalg.norm(ref))
    assert rel < 0.12, f"relative error too large: {rel}"

    print("KERNEL_OK")
</pallas_src>

<mosaic_0001>
module attributes {stable_mosaic.version = 11 : i64} {
  func.func @_add_norm_kernel(%arg0: i32, %arg1: memref<16x32xf32, #tpu.memory_space<vmem>>, %arg2: memref<16x32xf32, #tpu.memory_space<vmem>>, %arg3: memref<1x32xf32, #tpu.memory_space<vmem>>, %arg4: memref<1x32xf32, #tpu.memory_space<vmem>>, %arg5: memref<16x32xf32, #tpu.memory_space<vmem>>) attributes {dimension_semantics = [#tpu.dimension_semantics<parallel>], iteration_bounds = array<i64: 1>, scalar_prefetch = 0 : i64, scratch_operands = 0 : i64, tpu.core_type = #tpu.core_type<tc>, window_params = [{transform_indices = @transform_0, window_bounds = array<i64: 16, 32>}, {transform_indices = @transform_1, window_bounds = array<i64: 16, 32>}, {pipeline_mode = #tpu.pipeline_mode<synchronous>, transform_indices = @transform_2, window_bounds = array<i64: 1, 32>}, {pipeline_mode = #tpu.pipeline_mode<synchronous>, transform_indices = @transform_3, window_bounds = array<i64: 1, 32>}, {transform_indices = @transform_4, window_bounds = array<i64: 16, 32>}]} {
    %c0 = arith.constant 0 : index
    %c0_0 = arith.constant 0 : index
    %0 = vector.load %arg1[%c0, %c0_0] : memref<16x32xf32, #tpu.memory_space<vmem>>, vector<16x32xf32>
    %c0_1 = arith.constant 0 : index
    %c0_2 = arith.constant 0 : index
    %1 = vector.load %arg2[%c0_1, %c0_2] : memref<16x32xf32, #tpu.memory_space<vmem>>, vector<16x32xf32>
    %2 = arith.addf %0, %1 : vector<16x32xf32>
    %c0_3 = arith.constant 0 : index
    %c0_4 = arith.constant 0 : index
    %3 = vector.load %arg3[%c0_3, %c0_4] : memref<1x32xf32, #tpu.memory_space<vmem>>, vector<1x32xf32>
    %c0_5 = arith.constant 0 : index
    %c0_6 = arith.constant 0 : index
    %4 = vector.load %arg4[%c0_5, %c0_6] : memref<1x32xf32, #tpu.memory_space<vmem>>, vector<1x32xf32>
    %cst = arith.constant dense<0.000000e+00> : vector<16xf32>
    %5 = vector.multi_reduction <add>, %2, %cst [1] : vector<16x32xf32> to vector<16xf32>
    %6 = vector.shape_cast %5 : vector<16xf32> to vector<16x1xf32>
    %cst_7 = arith.constant 3.200000e+01 : f32
    %7 = vector.broadcast %cst_7 : f32 to vector<16x1xf32>
    %8 = arith.divf %6, %7 : vector<16x1xf32>
    %9 = vector.broadcast %8 : vector<16x1xf32> to vector<16x32xf32>
    %10 = arith.subf %2, %9 : vector<16x32xf32>
    %11 = arith.mulf %10, %10 : vector<16x32xf32>
    %cst_8 = arith.constant dense<0.000000e+00> : vector<16xf32>
    %12 = vector.multi_reduction <add>, %11, %cst_8 [1] : vector<16x32xf32> to vector<16xf32>
    %13 = vector.shape_cast %12 : vector<16xf32> to vector<16x1xf32>
    %cst_9 = arith.constant 3.200000e+01 : f32
    %14 = vector.broadcast %cst_9 : f32 to vector<16x1xf32>
    %15 = arith.divf %13, %14 : vector<16x1xf32>
    %cst_10 = arith.constant 9.99999996E-13 : f32
    %16 = vector.broadcast %cst_10 : f32 to vector<16x1xf32>
    %17 = arith.addf %15, %16 : vector<16x1xf32>
    %18 = math.rsqrt %17 : vector<16x1xf32>
    %19 = vector.broadcast %18 : vector<16x1xf32> to vector<16x32xf32>
    %20 = arith.mulf %10, %19 : vector<16x32xf32>
    %21 = vector.broadcast %3 : vector<1x32xf32> to vector<16x32xf32>
    %22 = arith.mulf %21, %20 : vector<16x32xf32>
    %23 = vector.broadcast %4 : vector<1x32xf32> to vector<16x32xf32>
    %24 = arith.addf %22, %23 : vector<16x32xf32>
    %c0_11 = arith.constant 0 : index
    %c0_12 = arith.constant 0 : index
    %25 = vector.load %arg5[%c0_11, %c0_12] : memref<16x32xf32, #tpu.memory_space<vmem>>, vector<16x32xf32>
    tpu.vector_store %arg5[%c0_11, %c0_12], %24 {strides = array<i32>} : memref<16x32xf32, #tpu.memory_space<vmem>>, vector<16x32xf32>,
    return
  }
  func.func @transform_0(%arg0: i32) -> (i32, i32) {
    %c0_i32 = arith.constant 0 : i32
    %c0_i32_0 = arith.constant 0 : i32
    return %arg0, %c0_i32 : i32, i32
  }
  func.func @transform_1(%arg0: i32) -> (i32, i32) {
    %c0_i32 = arith.constant 0 : i32
    %c0_i32_0 = arith.constant 0 : i32
    return %arg0, %c0_i32 : i32, i32
  }
  func.func @transform_2(%arg0: i32) -> (i32, i32) {
    %c0_i32 = arith.constant 0 : i32
    %c0_i32_0 = arith.constant 0 : i32
    %c0_i32_1 = arith.constant 0 : i32
    return %c0_i32, %c0_i32_0 : i32, i32
  }
  func.func @transform_3(%arg0: i32) -> (i32, i32) {
    %c0_i32 = arith.constant 0 : i32
    %c0_i32_0 = arith.constant 0 : i32
    %c0_i32_1 = arith.constant 0 : i32
    return %c0_i32, %c0_i32_0 : i32, i32
  }
  func.func @transform_4(%arg0: i32) -> (i32, i32) {
    %c0_i32 = arith.constant 0 : i32
    %c0_i32_0 = arith.constant 0 : i32
    return %arg0, %c0_i32 : i32, i32
  }
}

module attributes {stable_mosaic.version = 11 : i64} {
  func.func @_norm_kernel(%arg0: i32, %arg1: memref<16x32xf32, #tpu.memory_space<vmem>>, %arg2: memref<1x32xf32, #tpu.memory_space<vmem>>, %arg3: memref<1x32xf32, #tpu.memory_space<vmem>>, %arg4: memref<16x32xf32, #tpu.memory_space<vmem>>) attributes {dimension_semantics = [#tpu.dimension_semantics<parallel>], iteration_bounds = array<i64: 1>, scalar_prefetch = 0 : i64, scratch_operands = 0 : i64, tpu.core_type = #tpu.core_type<tc>, window_params = [{transform_indices = @transform_0, window_bounds = array<i64: 16, 32>}, {pipeline_mode = #tpu.pipeline_mode<synchronous>, transform_indices = @transform_1, window_bounds = array<i64: 1, 32>}, {pipeline_mode = #tpu.pipeline_mode<synchronous>, transform_indices = @transform_2, window_bounds = array<i64: 1, 32>}, {transform_indices = @transform_3, window_bounds = array<i64: 16, 32>}]} {
    %c0 = arith.constant 0 : index
    %c0_0 = arith.constant 0 : index
    %0 = vector.load %arg1[%c0, %c0_0] : memref<16x32xf32, #tpu.memory_space<vmem>>, vector<16x32xf32>
    %c0_1 = arith.constant 0 : index
    %c0_2 = arith.constant 0 : index
    %1 = vector.load %arg2[%c0_1, %c0_2] : memref<1x32xf32, #tpu.memory_space<vmem>>, vector<1x32xf32>
    %c0_3 = arith.constant 0 : index
    %c0_4 = arith.constant 0 : index
    %2 = vector.load %arg3[%c0_3, %c0_4] : memref<1x32xf32, #tpu.memory_space<vmem>>, vector<1x32xf32>
    %cst = arith.constant dense<0.000000e+00> : vector<16xf32>
    %3 = vector.multi_reduction <add>, %0, %cst [1] : vector<16x32xf32> to vector<16xf32>
    %4 = vector.shape_cast %3 : vector<16xf32> to vector<16x1xf32>
    %cst_5 = arith.constant 3.200000e+01 : f32
    %5 = vector.broadcast %cst_5 : f32 to vector<16x1xf32>
    %6 = arith.divf %4, %5 : vector<16x1xf32>
    %7 = vector.broadcast %6 : vector<16x1xf32> to vector<16x32xf32>
    %8 = arith.subf %0, %7 : vector<16x32xf32>
    %9 = arith.mulf %8, %8 : vector<16x32xf32>
    %cst_6 = arith.constant dense<0.000000e+00> : vector<16xf32>
    %10 = vector.multi_reduction <add>, %9, %cst_6 [1] : vector<16x32xf32> to vector<16xf32>
    %11 = vector.shape_cast %10 : vector<16xf32> to vector<16x1xf32>
    %cst_7 = arith.constant 3.200000e+01 : f32
    %12 = vector.broadcast %cst_7 : f32 to vector<16x1xf32>
    %13 = arith.divf %11, %12 : vector<16x1xf32>
    %cst_8 = arith.constant 9.99999996E-13 : f32
    %14 = vector.broadcast %cst_8 : f32 to vector<16x1xf32>
    %15 = arith.addf %13, %14 : vector<16x1xf32>
    %16 = math.rsqrt %15 : vector<16x1xf32>
    %17 = vector.broadcast %16 : vector<16x1xf32> to vector<16x32xf32>
    %18 = arith.mulf %8, %17 : vector<16x32xf32>
    %19 = vector.broadcast %1 : vector<1x32xf32> to vector<16x32xf32>
    %20 = arith.mulf %19, %18 : vector<16x32xf32>
    %21 = vector.broadcast %2 : vector<1x32xf32> to vector<16x32xf32>
    %22 = arith.addf %20, %21 : vector<16x32xf32>
    %c0_9 = arith.constant 0 : index
    %c0_10 = arith.constant 0 : index
    %23 = vector.load %arg4[%c0_9, %c0_10] : memref<16x32xf32, #tpu.memory_space<vmem>>, vector<16x32xf32>
    tpu.vector_store %arg4[%c0_9, %c0_10], %22 {strides = array<i32>} : memref<16x32xf32, #tpu.memory_space<vmem>>, vector<16x32xf32>,
    return
  }
  func.func @transform_0(%arg0: i32) -> (i32, i32) {
    %c0_i32 = arith.constant 0 : i32
    %c0_i32_0 = arith.constant 0 : i32
    return %arg0, %c0_i32 : i32, i32
  }
  func.func @transform_1(%arg0: i32) -> (i32, i32) {
    %c0_i32 = arith.constant 0 : i32
    %c0_i32_0 = arith.constant 0 : i32
    %c0_i32_1 = arith.constant 0 : i32
    return %c0_i32, %c0_i32_0 : i32, i32
  }
  func.func @transform_2(%arg0: i32) -> (i32, i32) {
    %c0_i32 = arith.constant 0 : i32
    %c0_i32_0 = arith.constant 0 : i32
    %c0_i32_1 = arith.constant 0 : i32
    return %c0_i32, %c0_i32_0 : i32, i32
  }
  func.func @transform_3(%arg0: i32) -> (i32, i32) {
    %c0_i32 = arith.constant 0 : i32
    %c0_i32_0 = arith.constant 0 : i32
    return %arg0, %c0_i32 : i32, i32
  }
}

module attributes {stable_mosaic.version = 11 : i64} {
  func.func @_linear_kernel(%arg0: i32, %arg1: i32, %arg2: memref<16x24xf32, #tpu.memory_space<vmem>>, %arg3: memref<24x32xbf16, #tpu.memory_space<vmem>>, %arg4: memref<1x32xf32, #tpu.memory_space<vmem>>, %arg5: memref<16x32xf32, #tpu.memory_space<vmem>>) attributes {dimension_semantics = [#tpu.dimension_semantics<parallel>, #tpu.dimension_semantics<parallel>], iteration_bounds = array<i64: 1, 1>, scalar_prefetch = 0 : i64, scratch_operands = 0 : i64, tpu.core_type = #tpu.core_type<tc>, window_params = [{transform_indices = @transform_0, window_bounds = array<i64: 16, 24>}, {transform_indices = @transform_1, window_bounds = array<i64: 24, 32>}, {transform_indices = @transform_2, window_bounds = array<i64: 1, 32>}, {transform_indices = @transform_3, window_bounds = array<i64: 16, 32>}]} {
    %c0 = arith.constant 0 : index
    %c0_0 = arith.constant 0 : index
    %0 = vector.load %arg2[%c0, %c0_0] : memref<16x24xf32, #tpu.memory_space<vmem>>, vector<16x24xf32>
    %1 = arith.truncf %0 : vector<16x24xf32> to vector<16x24xbf16>
    %c0_1 = arith.constant 0 : index
    %c0_2 = arith.constant 0 : index
    %2 = vector.load %arg3[%c0_1, %c0_2] : memref<24x32xbf16, #tpu.memory_space<vmem>>, vector<24x32xbf16>
    %cst = arith.constant dense<0.000000e+00> : vector<16x32xf32>
    %3 = tpu.matmul %1, %2, %cst {dimension_numbers = #tpu.dot_dimension_numbers<[1], [0], [0], [1], [0, 0, 1, 1], [], []>} : vector<16x24xbf16>, vector<24x32xbf16>, vector<16x32xf32> -> vector<16x32xf32>
    %c0_3 = arith.constant 0 : index
    %c0_4 = arith.constant 0 : index
    %4 = vector.load %arg4[%c0_3, %c0_4] : memref<1x32xf32, #tpu.memory_space<vmem>>, vector<1x32xf32>
    %5 = vector.broadcast %4 : vector<1x32xf32> to vector<16x32xf32>
    %6 = arith.addf %3, %5 : vector<16x32xf32>
    %c0_5 = arith.constant 0 : index
    %c0_6 = arith.constant 0 : index
    %7 = vector.load %arg5[%c0_5, %c0_6] : memref<16x32xf32, #tpu.memory_space<vmem>>, vector<16x32xf32>
    tpu.vector_store %arg5[%c0_5, %c0_6], %6 {strides = array<i32>} : memref<16x32xf32, #tpu.memory_space<vmem>>, vector<16x32xf32>,
    return
  }
  func.func @transform_0(%arg0: i32, %arg1: i32) -> (i32, i32) {
    %c0_i32 = arith.constant 0 : i32
    %c0_i32_0 = arith.constant 0 : i32
    return %arg0, %c0_i32 : i32, i32
  }
  func.func @transform_1(%arg0: i32, %arg1: i32) -> (i32, i32) {
    %c0_i32 = arith.constant 0 : i32
    %c0_i32_0 = arith.constant 0 : i32
    return %c0_i32, %arg1 : i32, i32
  }
  func.func @transform_2(%arg0: i32, %arg1: i32) -> (i32, i32) {
    %c0_i32 = arith.constant 0 : i32
    %c0_i32_0 = arith.constant 0 : i32
    return %c0_i32, %arg1 : i32, i32
  }
  func.func @transform_3(%arg0: i32, %arg1: i32) -> (i32, i32) {
    %c0_i32 = arith.constant 0 : i32
    return %arg0, %arg1 : i32, i32
  }
}

module attributes {stable_mosaic.version = 11 : i64} {
  func.func @_linear_kernel(%arg0: i32, %arg1: i32, %arg2: memref<16x32xf32, #tpu.memory_space<vmem>>, %arg3: memref<32x96xbf16, #tpu.memory_space<vmem>>, %arg4: memref<1x96xf32, #tpu.memory_space<vmem>>, %arg5: memref<16x96xf32, #tpu.memory_space<vmem>>) attributes {dimension_semantics = [#tpu.dimension_semantics<parallel>, #tpu.dimension_semantics<parallel>], iteration_bounds = array<i64: 1, 1>, scalar_prefetch = 0 : i64, scratch_operands = 0 : i64, tpu.core_type = #tpu.core_type<tc>, window_params = [{transform_indices = @transform_0, window_bounds = array<i64: 16, 32>}, {transform_indices = @transform_1, window_bounds = array<i64: 32, 96>}, {transform_indices = @transform_2, window_bounds = array<i64: 1, 96>}, {transform_indices = @transform_3, window_bounds = array<i64: 16, 96>}]} {
    %c0 = arith.constant 0 : index
    %c0_0 = arith.constant 0 : index
    %0 = vector.load %arg2[%c0, %c0_0] : memref<16x32xf32, #tpu.memory_space<vmem>>, vector<16x32xf32>
    %1 = arith.truncf %0 : vector<16x32xf32> to vector<16x32xbf16>
    %c0_1 = arith.constant 0 : index
    %c0_2 = arith.constant 0 : index
    %2 = vector.load %arg3[%c0_1, %c0_2] : memref<32x96xbf16, #tpu.memory_space<vmem>>, vector<32x96xbf16>
    %cst = arith.constant dense<0.000000e+00> : vector<16x96xf32>
    %3 = tpu.matmul %1, %2, %cst {dimension_numbers = #tpu.dot_dimension_numbers<[1], [0], [0], [1], [0, 0, 1, 1], [], []>} : vector<16x32xbf16>, vector<32x96xbf16>, vector<16x96xf32> -> vector<16x96xf32>
    %c0_3 = arith.constant 0 : index
    %c0_4 = arith.constant 0 : index
    %4 = vector.load %arg4[%c0_3, %c0_4] : memref<1x96xf32, #tpu.memory_space<vmem>>, vector<1x96xf32>
    %5 = vector.broadcast %4 : vector<1x96xf32> to vector<16x96xf32>
    %6 = arith.addf %3, %5 : vector<16x96xf32>
    %c0_5 = arith.constant 0 : index
    %c0_6 = arith.constant 0 : index
    %7 = vector.load %arg5[%c0_5, %c0_6] : memref<16x96xf32, #tpu.memory_space<vmem>>, vector<16x96xf32>
    tpu.vector_store %arg5[%c0_5, %c0_6], %6 {strides = array<i32>} : memref<16x96xf32, #tpu.memory_space<vmem>>, vector<16x96xf32>,
    return
  }
  func.func @transform_0(%arg0: i32, %arg1: i32) -> (i32, i32) {
    %c0_i32 = arith.constant 0 : i32
    %c0_i32_0 = arith.constant 0 : i32
    return %arg0, %c0_i32 : i32, i32
  }
  func.func @transform_1(%arg0: i32, %arg1: i32) -> (i32, i32) {
    %c0_i32 = arith.constant 0 : i32
    %c0_i32_0 = arith.constant 0 : i32
    return %c0_i32, %arg1 : i32, i32
  }
  func.func @transform_2(%arg0: i32, %arg1: i32) -> (i32, i32) {
    %c0_i32 = arith.constant 0 : i32
    %c0_i32_0 = arith.constant 0 : i32
    return %c0_i32, %arg1 : i32, i32
  }
  func.func @transform_3(%arg0: i32, %arg1: i32) -> (i32, i32) {
    %c0_i32 = arith.constant 0 : i32
    return %arg0, %arg1 : i32, i32
  }
}

module attributes {stable_mosaic.version = 11 : i64} {
  func.func @_linear_kernel(%arg0: i32, %arg1: i32, %arg2: memref<16x32xf32, #tpu.memory_space<vmem>>, %arg3: memref<32x32xbf16, #tpu.memory_space<vmem>>, %arg4: memref<1x32xf32, #tpu.memory_space<vmem>>, %arg5: memref<16x32xf32, #tpu.memory_space<vmem>>) attributes {dimension_semantics = [#tpu.dimension_semantics<parallel>, #tpu.dimension_semantics<parallel>], iteration_bounds = array<i64: 1, 1>, scalar_prefetch = 0 : i64, scratch_operands = 0 : i64, tpu.core_type = #tpu.core_type<tc>, window_params = [{transform_indices = @transform_0, window_bounds = array<i64: 16, 32>}, {transform_indices = @transform_1, window_bounds = array<i64: 32, 32>}, {transform_indices = @transform_2, window_bounds = array<i64: 1, 32>}, {transform_indices = @transform_3, window_bounds = array<i64: 16, 32>}]} {
    %c0 = arith.constant 0 : index
    %c0_0 = arith.constant 0 : index
    %0 = vector.load %arg2[%c0, %c0_0] : memref<16x32xf32, #tpu.memory_space<vmem>>, vector<16x32xf32>
    %1 = arith.truncf %0 : vector<16x32xf32> to vector<16x32xbf16>
    %c0_1 = arith.constant 0 : index
    %c0_2 = arith.constant 0 : index
    %2 = vector.load %arg3[%c0_1, %c0_2] : memref<32x32xbf16, #tpu.memory_space<vmem>>, vector<32x32xbf16>
    %cst = arith.constant dense<0.000000e+00> : vector<16x32xf32>
    %3 = tpu.matmul %1, %2, %cst {dimension_numbers = #tpu.dot_dimension_numbers<[1], [0], [0], [1], [0, 0, 1, 1], [], []>} : vector<16x32xbf16>, vector<32x32xbf16>, vector<16x32xf32> -> vector<16x32xf32>
    %c0_3 = arith.constant 0 : index
    %c0_4 = arith.constant 0 : index
    %4 = vector.load %arg4[%c0_3, %c0_4] : memref<1x32xf32, #tpu.memory_space<vmem>>, vector<1x32xf32>
    %5 = vector.broadcast %4 : vector<1x32xf32> to vector<16x32xf32>
    %6 = arith.addf %3, %5 : vector<16x32xf32>
    %c0_5 = arith.constant 0 : index
    %c0_6 = arith.constant 0 : index
    %7 = vector.load %arg5[%c0_5, %c0_6] : memref<16x32xf32, #tpu.memory_space<vmem>>, vector<16x32xf32>
    tpu.vector_store %arg5[%c0_5, %c0_6], %6 {strides = array<i32>} : memref<16x32xf32, #tpu.memory_space<vmem>>, vector<16x32xf32>,
    return
  }
  func.func @transform_0(%arg0: i32, %arg1: i32) -> (i32, i32) {
    %c0_i32 = arith.constant 0 : i32
    %c0_i32_0 = arith.constant 0 : i32
    return %arg0, %c0_i32 : i32, i32
  }
  func.func @transform_1(%arg0: i32, %arg1: i32) -> (i32, i32) {
    %c0_i32 = arith.constant 0 : i32
    %c0_i32_0 = arith.constant 0 : i32
    return %c0_i32, %arg1 : i32, i32
  }
  func.func @transform_2(%arg0: i32, %arg1: i32) -> (i32, i32) {
    %c0_i32 = arith.constant 0 : i32
    %c0_i32_0 = arith.constant 0 : i32
    return %c0_i32, %arg1 : i32, i32
  }
  func.func @transform_3(%arg0: i32, %arg1: i32) -> (i32, i32) {
    %c0_i32 = arith.constant 0 : i32
    return %arg0, %arg1 : i32, i32
  }
}

module attributes {stable_mosaic.version = 11 : i64} {
  func.func @_linear_kernel(%arg0: i32, %arg1: i32, %arg2: memref<16x32xf32, #tpu.memory_space<vmem>>, %arg3: memref<32x64xbf16, #tpu.memory_space<vmem>>, %arg4: memref<1x64xf32, #tpu.memory_space<vmem>>, %arg5: memref<16x64xf32, #tpu.memory_space<vmem>>) attributes {dimension_semantics = [#tpu.dimension_semantics<parallel>, #tpu.dimension_semantics<parallel>], iteration_bounds = array<i64: 1, 1>, scalar_prefetch = 0 : i64, scratch_operands = 0 : i64, tpu.core_type = #tpu.core_type<tc>, window_params = [{transform_indices = @transform_0, window_bounds = array<i64: 16, 32>}, {transform_indices = @transform_1, window_bounds = array<i64: 32, 64>}, {transform_indices = @transform_2, window_bounds = array<i64: 1, 64>}, {transform_indices = @transform_3, window_bounds = array<i64: 16, 64>}]} {
    %c0 = arith.constant 0 : index
    %c0_0 = arith.constant 0 : index
    %0 = vector.load %arg2[%c0, %c0_0] : memref<16x32xf32, #tpu.memory_space<vmem>>, vector<16x32xf32>
    %1 = arith.truncf %0 : vector<16x32xf32> to vector<16x32xbf16>
    %c0_1 = arith.constant 0 : index
    %c0_2 = arith.constant 0 : index
    %2 = vector.load %arg3[%c0_1, %c0_2] : memref<32x64xbf16, #tpu.memory_space<vmem>>, vector<32x64xbf16>
    %cst = arith.constant dense<0.000000e+00> : vector<16x64xf32>
    %3 = tpu.matmul %1, %2, %cst {dimension_numbers = #tpu.dot_dimension_numbers<[1], [0], [0], [1], [0, 0, 1, 1], [], []>} : vector<16x32xbf16>, vector<32x64xbf16>, vector<16x64xf32> -> vector<16x64xf32>
    %c0_3 = arith.constant 0 : index
    %c0_4 = arith.constant 0 : index
    %4 = vector.load %arg4[%c0_3, %c0_4] : memref<1x64xf32, #tpu.memory_space<vmem>>, vector<1x64xf32>
    %5 = vector.broadcast %4 : vector<1x64xf32> to vector<16x64xf32>
    %6 = arith.addf %3, %5 : vector<16x64xf32>
    %cst_5 = arith.constant 5.000000e-01 : f32
    %7 = vector.broadcast %cst_5 : f32 to vector<16x64xf32>
    %8 = arith.mulf %6, %7 : vector<16x64xf32>
    %cst_6 = arith.constant 0.707106769 : f32
    %9 = vector.broadcast %cst_6 : f32 to vector<16x64xf32>
    %10 = arith.mulf %6, %9 : vector<16x64xf32>
    %cst_7 = arith.constant 0.000000e+00 : f32
    %11 = vector.broadcast %cst_7 : f32 to vector<16x64xf32>
    %12 = arith.cmpf oge, %10, %11 : vector<16x64xf32>
    %cst_8 = arith.constant 1.000000e+00 : f32
    %cst_9 = arith.constant -1.000000e+00 : f32
    %13 = vector.broadcast %cst_8 : f32 to vector<16x64xf32>
    %14 = vector.broadcast %cst_9 : f32 to vector<16x64xf32>
    %15 = arith.select %12, %13, %14 : vector<16x64xi1>, vector<16x64xf32>
    %16 = math.absf %10 : vector<16x64xf32>
    %cst_10 = arith.constant 0.327591091 : f32
    %17 = vector.broadcast %cst_10 : f32 to vector<16x64xf32>
    %18 = arith.mulf %17, %16 : vector<16x64xf32>
    %cst_11 = arith.constant 1.000000e+00 : f32
    %19 = vector.broadcast %cst_11 : f32 to vector<16x64xf32>
    %20 = arith.addf %19, %18 : vector<16x64xf32>
    %cst_12 = arith.constant 1.000000e+00 : f32
    %21 = vector.broadcast %cst_12 : f32 to vector<16x64xf32>
    %22 = arith.divf %21, %20 : vector<16x64xf32>
    %cst_13 = arith.constant 1.06140542 : f32
    %23 = vector.broadcast %cst_13 : f32 to vector<16x64xf32>
    %24 = arith.mulf %23, %22 : vector<16x64xf32>
    %cst_14 = arith.constant -1.45315206 : f32
    %25 = vector.broadcast %cst_14 : f32 to vector<16x64xf32>
    %26 = arith.addf %24, %25 : vector<16x64xf32>
    %27 = arith.mulf %26, %22 : vector<16x64xf32>
    %cst_15 = arith.constant 1.42141378 : f32
    %28 = vector.broadcast %cst_15 : f32 to vector<16x64xf32>
    %29 = arith.addf %27, %28 : vector<16x64xf32>
    %30 = arith.mulf %29, %22 : vector<16x64xf32>
    %cst_16 = arith.constant -0.284496725 : f32
    %31 = vector.broadcast %cst_16 : f32 to vector<16x64xf32>
    %32 = arith.addf %30, %31 : vector<16x64xf32>
    %33 = arith.mulf %32, %22 : vector<16x64xf32>
    %cst_17 = arith.constant 0.254829586 : f32
    %34 = vector.broadcast %cst_17 : f32 to vector<16x64xf32>
    %35 = arith.addf %33, %34 : vector<16x64xf32>
    %36 = arith.mulf %35, %22 : vector<16x64xf32>
    %cst_18 = arith.constant 0.000000e+00 : f32
    %37 = vector.broadcast %cst_18 : f32 to vector<16x64xf32>
    %38 = arith.subf %37, %16 : vector<16x64xf32>
    %39 = arith.mulf %38, %16 : vector<16x64xf32>
    %40 = math.exp %39 : vector<16x64xf32>
    %41 = arith.mulf %36, %40 : vector<16x64xf32>
    %cst_19 = arith.constant 1.000000e+00 : f32
    %42 = vector.broadcast %cst_19 : f32 to vector<16x64xf32>
    %43 = arith.subf %42, %41 : vector<16x64xf32>
    %44 = arith.mulf %15, %43 : vector<16x64xf32>
    %cst_20 = arith.constant 1.000000e+00 : f32
    %45 = vector.broadcast %cst_20 : f32 to vector<16x64xf32>
    %46 = arith.addf %45, %44 : vector<16x64xf32>
    %47 = arith.mulf %8, %46 : vector<16x64xf32>
    %c0_21 = arith.constant 0 : index
    %c0_22 = arith.constant 0 : index
    %48 = vector.load %arg5[%c0_21, %c0_22] : memref<16x64xf32, #tpu.memory_space<vmem>>, vector<16x64xf32>
    tpu.vector_store %arg5[%c0_21, %c0_22], %47 {strides = array<i32>} : memref<16x64xf32, #tpu.memory_space<vmem>>, vector<16x64xf32>,
    return
  }
  func.func @transform_0(%arg0: i32, %arg1: i32) -> (i32, i32) {
    %c0_i32 = arith.constant 0 : i32
    %c0_i32_0 = arith.constant 0 : i32
    return %arg0, %c0_i32 : i32, i32
  }
  func.func @transform_1(%arg0: i32, %arg1: i32) -> (i32, i32) {
    %c0_i32 = arith.constant 0 : i32
    %c0_i32_0 = arith.constant 0 : i32
    return %c0_i32, %arg1 : i32, i32
  }
  func.func @transform_2(%arg0: i32, %arg1: i32) -> (i32, i32) {
    %c0_i32 = arith.constant 0 : i32
    %c0_i32_0 = arith.constant 0 : i32
    return %c0_i32, %arg1 : i32, i32
  }
  func.func @transform_3(%arg0: i32, %arg1: i32) -> (i32, i32) {
    %c0_i32 = arith.constant 0 : i32
    return %arg0, %arg1 : i32, i32
  }
}

module attributes {stable_mosaic.version = 11 : i64} {
  func.func @_linear_kernel(%arg0: i32, %arg1: i32, %arg2: memref<16x64xf32, #tpu.memory_space<vmem>>, %arg3: memref<64x32xbf16, #tpu.memory_space<vmem>>, %arg4: memref<1x32xf32, #tpu.memory_space<vmem>>, %arg5: memref<16x32xf32, #tpu.memory_space<vmem>>) attributes {dimension_semantics = [#tpu.dimension_semantics<parallel>, #tpu.dimension_semantics<parallel>], iteration_bounds = array<i64: 1, 1>, scalar_prefetch = 0 : i64, scratch_operands = 0 : i64, tpu.core_type = #tpu.core_type<tc>, window_params = [{transform_indices = @transform_0, window_bounds = array<i64: 16, 64>}, {transform_indices = @transform_1, window_bounds = array<i64: 64, 32>}, {transform_indices = @transform_2, window_bounds = array<i64: 1, 32>}, {transform_indices = @transform_3, window_bounds = array<i64: 16, 32>}]} {
    %c0 = arith.constant 0 : index
    %c0_0 = arith.constant 0 : index
    %0 = vector.load %arg2[%c0, %c0_0] : memref<16x64xf32, #tpu.memory_space<vmem>>, vector<16x64xf32>
    %1 = arith.truncf %0 : vector<16x64xf32> to vector<16x64xbf16>
    %c0_1 = arith.constant 0 : index
    %c0_2 = arith.constant 0 : index
    %2 = vector.load %arg3[%c0_1, %c0_2] : memref<64x32xbf16, #tpu.memory_space<vmem>>, vector<64x32xbf16>
    %cst = arith.constant dense<0.000000e+00> : vector<16x32xf32>
    %3 = tpu.matmul %1, %2, %cst {dimension_numbers = #tpu.dot_dimension_numbers<[1], [0], [0], [1], [0, 0, 1, 1], [], []>} : vector<16x64xbf16>, vector<64x32xbf16>, vector<16x32xf32> -> vector<16x32xf32>
    %c0_3 = arith.constant 0 : index
    %c0_4 = arith.constant 0 : index
    %4 = vector.load %arg4[%c0_3, %c0_4] : memref<1x32xf32, #tpu.memory_space<vmem>>, vector<1x32xf32>
    %5 = vector.broadcast %4 : vector<1x32xf32> to vector<16x32xf32>
    %6 = arith.addf %3, %5 : vector<16x32xf32>
    %c0_5 = arith.constant 0 : index
    %c0_6 = arith.constant 0 : index
    %7 = vector.load %arg5[%c0_5, %c0_6] : memref<16x32xf32, #tpu.memory_space<vmem>>, vector<16x32xf32>
    tpu.vector_store %arg5[%c0_5, %c0_6], %6 {strides = array<i32>} : memref<16x32xf32, #tpu.memory_space<vmem>>, vector<16x32xf32>,
    return
  }
  func.func @transform_0(%arg0: i32, %arg1: i32) -> (i32, i32) {
    %c0_i32 = arith.constant 0 : i32
    %c0_i32_0 = arith.constant 0 : i32
    return %arg0, %c0_i32 : i32, i32
  }
  func.func @transform_1(%arg0: i32, %arg1: i32) -> (i32, i32) {
    %c0_i32 = arith.constant 0 : i32
    %c0_i32_0 = arith.constant 0 : i32
    return %c0_i32, %arg1 : i32, i32
  }
  func.func @transform_2(%arg0: i32, %arg1: i32) -> (i32, i32) {
    %c0_i32 = arith.constant 0 : i32
    %c0_i32_0 = arith.constant 0 : i32
    return %c0_i32, %arg1 : i32, i32
  }
  func.func @transform_3(%arg0: i32, %arg1: i32) -> (i32, i32) {
    %c0_i32 = arith.constant 0 : i32
    return %arg0, %arg1 : i32, i32
  }
}

module attributes {stable_mosaic.version = 11 : i64} {
  func.func @_attention_kernel(%arg0: i32, %arg1: memref<1x8x8xf32, #tpu.memory_space<vmem>>, %arg2: memref<1x8x8xf32, #tpu.memory_space<vmem>>, %arg3: memref<1x8x8xf32, #tpu.memory_space<vmem>>, %arg4: memref<1x8x8xf32, #tpu.memory_space<vmem>>) attributes {dimension_semantics = [#tpu.dimension_semantics<parallel>], iteration_bounds = array<i64: 8>, scalar_prefetch = 0 : i64, scratch_operands = 0 : i64, tpu.core_type = #tpu.core_type<tc>, window_params = [{transform_indices = @transform_0, window_bounds = array<i64: 1, 8, 8>}, {transform_indices = @transform_1, window_bounds = array<i64: 1, 8, 8>}, {transform_indices = @transform_2, window_bounds = array<i64: 1, 8, 8>}, {transform_indices = @transform_3, window_bounds = array<i64: 1, 8, 8>}]} {
    %c0 = arith.constant 0 : index
    %c0_0 = arith.constant 0 : index
    %c0_1 = arith.constant 0 : index
    %0 = vector.load %arg1[%c0, %c0_0, %c0_1] : memref<1x8x8xf32, #tpu.memory_space<vmem>>, vector<1x8x8xf32>
    %1 = vector.shape_cast %0 : vector<1x8x8xf32> to vector<8x8xf32>
    %c0_2 = arith.constant 0 : index
    %c0_3 = arith.constant 0 : index
    %c0_4 = arith.constant 0 : index
    %2 = vector.load %arg2[%c0_2, %c0_3, %c0_4] : memref<1x8x8xf32, #tpu.memory_space<vmem>>, vector<1x8x8xf32>
    %3 = vector.shape_cast %2 : vector<1x8x8xf32> to vector<8x8xf32>
    %c0_5 = arith.constant 0 : index
    %c0_6 = arith.constant 0 : index
    %c0_7 = arith.constant 0 : index
    %4 = vector.load %arg3[%c0_5, %c0_6, %c0_7] : memref<1x8x8xf32, #tpu.memory_space<vmem>>, vector<1x8x8xf32>
    %5 = vector.shape_cast %4 : vector<1x8x8xf32> to vector<8x8xf32>
    %cst = arith.constant dense<0.000000e+00> : vector<8x8xf32>
    %6 = tpu.matmul %1, %3, %cst {dimension_numbers = #tpu.dot_dimension_numbers<[1], [1], [0], [0], [0, 0, 1, 0], [], []>} : vector<8x8xf32>, vector<8x8xf32>, vector<8x8xf32> -> vector<8x8xf32>
    %cst_8 = arith.constant 0.353553385 : f32
    %7 = vector.broadcast %cst_8 : f32 to vector<8x8xf32>
    %8 = arith.mulf %6, %7 : vector<8x8xf32>
    %cst_9 = arith.constant dense<0xFF800000> : vector<8xf32>
    %9 = vector.multi_reduction <maximumf>, %8, %cst_9 [1] : vector<8x8xf32> to vector<8xf32>
    %10 = vector.shape_cast %9 : vector<8xf32> to vector<8x1xf32>
    %11 = vector.broadcast %10 : vector<8x1xf32> to vector<8x8xf32>
    %12 = arith.subf %8, %11 : vector<8x8xf32>
    %13 = math.exp %12 : vector<8x8xf32>
    %cst_10 = arith.constant dense<0.000000e+00> : vector<8xf32>
    %14 = vector.multi_reduction <add>, %13, %cst_10 [1] : vector<8x8xf32> to vector<8xf32>
    %15 = vector.shape_cast %14 : vector<8xf32> to vector<8x1xf32>
    %16 = vector.broadcast %15 : vector<8x1xf32> to vector<8x8xf32>
    %17 = arith.divf %13, %16 : vector<8x8xf32>
    %cst_11 = arith.constant dense<0.000000e+00> : vector<8x8xf32>
    %18 = tpu.matmul %17, %5, %cst_11 {dimension_numbers = #tpu.dot_dimension_numbers<[1], [0], [0], [1], [0, 0, 1, 1], [], []>} : vector<8x8xf32>, vector<8x8xf32>, vector<8x8xf32> -> vector<8x8xf32>
    %c0_12 = arith.constant 0 : index
    %c0_13 = arith.constant 0 : index
    %c0_14 = arith.constant 0 : index
    %19 = vector.load %arg4[%c0_12, %c0_13, %c0_14] : memref<1x8x8xf32, #tpu.memory_space<vmem>>, vector<1x8x8xf32>
    %20 = vector.shape_cast %19 : vector<1x8x8xf32> to vector<8x8xf32>
    %21 = vector.shape_cast %18 : vector<8x8xf32> to vector<1x8x8xf32>
    tpu.vector_store %arg4[%c0_12, %c0_13, %c0_14], %21 {strides = array<i32>} : memref<1x8x8xf32, #tpu.memory_space<vmem>>, vector<1x8x8xf32>,
    return
  }
  func.func @transform_0(%arg0: i32) -> (i32, i32, i32) {
    %c0_i32 = arith.constant 0 : i32
    %c0_i32_0 = arith.constant 0 : i32
    %c0_i32_1 = arith.constant 0 : i32
    return %arg0, %c0_i32, %c0_i32_0 : i32, i32, i32
  }
  func.func @transform_1(%arg0: i32) -> (i32, i32, i32) {
    %c0_i32 = arith.constant 0 : i32
    %c0_i32_0 = arith.constant 0 : i32
    %c0_i32_1 = arith.constant 0 : i32
    return %arg0, %c0_i32, %c0_i32_0 : i32, i32, i32
  }
  func.func @transform_2(%arg0: i32) -> (i32, i32, i32) {
    %c0_i32 = arith.constant 0 : i32
    %c0_i32_0 = arith.constant 0 : i32
    %c0_i32_1 = arith.constant 0 : i32
    return %arg0, %c0_i32, %c0_i32_0 : i32, i32, i32
  }
  func.func @transform_3(%arg0: i32) -> (i32, i32, i32) {
    %c0_i32 = arith.constant 0 : i32
    %c0_i32_0 = arith.constant 0 : i32
    %c0_i32_1 = arith.constant 0 : i32
    return %arg0, %c0_i32, %c0_i32_0 : i32, i32, i32
  }
}

module attributes {stable_mosaic.version = 11 : i64} {
  func.func @_add_norm_kernel(%arg0: i32, %arg1: memref<16x32xf32, #tpu.memory_space<vmem>>, %arg2: memref<16x32xf32, #tpu.memory_space<vmem>>, %arg3: memref<1x32xf32, #tpu.memory_space<vmem>>, %arg4: memref<1x32xf32, #tpu.memory_space<vmem>>, %arg5: memref<16x32xf32, #tpu.memory_space<vmem>>) attributes {dimension_semantics = [#tpu.dimension_semantics<parallel>], iteration_bounds = array<i64: 1>, scalar_prefetch = 0 : i64, scratch_operands = 0 : i64, tpu.core_type = #tpu.core_type<tc>, window_params = [{transform_indices = @transform_0, window_bounds = array<i64: 16, 32>}, {transform_indices = @transform_1, window_bounds = array<i64: 16, 32>}, {pipeline_mode = #tpu.pipeline_mode<synchronous>, transform_indices = @transform_2, window_bounds = array<i64: 1, 32>}, {pipeline_mode = #tpu.pipeline_mode<synchronous>, transform_indices = @transform_3, window_bounds = array<i64: 1, 32>}, {transform_indices = @transform_4, window_bounds = array<i64: 16, 32>}]} {
    %c0 = arith.constant 0 : index
    %c0_0 = arith.constant 0 : index
    %0 = vector.load %arg1[%c0, %c0_0] : memref<16x32xf32, #tpu.memory_space<vmem>>, vector<16x32xf32>
    %c0_1 = arith.constant 0 : index
    %c0_2 = arith.constant 0 : index
    %1 = vector.load %arg2[%c0_1, %c0_2] : memref<16x32xf32, #tpu.memory_space<vmem>>, vector<16x32xf32>
    %2 = arith.addf %0, %1 : vector<16x32xf32>
    %c0_3 = arith.constant 0 : index
    %c0_4 = arith.constant 0 : index
    %3 = vector.load %arg3[%c0_3, %c0_4] : memref<1x32xf32, #tpu.memory_space<vmem>>, vector<1x32xf32>
    %c0_5 = arith.constant 0 : index
    %c0_6 = arith.constant 0 : index
    %4 = vector.load %arg4[%c0_5, %c0_6] : memref<1x32xf32, #tpu.memory_space<vmem>>, vector<1x32xf32>
    %cst = arith.constant dense<0.000000e+00> : vector<16xf32>
    %5 = vector.multi_reduction <add>, %2, %cst [1] : vector<16x32xf32> to vector<16xf32>
    %6 = vector.shape_cast %5 : vector<16xf32> to vector<16x1xf32>
    %cst_7 = arith.constant 3.200000e+01 : f32
    %7 = vector.broadcast %cst_7 : f32 to vector<16x1xf32>
    %8 = arith.divf %6, %7 : vector<16x1xf32>
    %9 = vector.broadcast %8 : vector<16x1xf32> to vector<16x32xf32>
    %10 = arith.subf %2, %9 : vector<16x32xf32>
    %11 = arith.mulf %10, %10 : vector<16x32xf32>
    %cst_8 = arith.constant dense<0.000000e+00> : vector<16xf32>
    %12 = vector.multi_reduction <add>, %11, %cst_8 [1] : vector<16x32xf32> to vector<16xf32>
    %13 = vector.shape_cast %12 : vector<16xf32> to vector<16x1xf32>
    %cst_9 = arith.constant 3.200000e+01 : f32
    %14 = vector.broadcast %cst_9 : f32 to vector<16x1xf32>
    %15 = arith.divf %13, %14 : vector<16x1xf32>
    %cst_10 = arith.constant 9.99999996E-13 : f32
    %16 = vector.broadcast %cst_10 : f32 to vector<16x1xf32>
    %17 = arith.addf %15, %16 : vector<16x1xf32>
    %18 = math.rsqrt %17 : vector<16x1xf32>
    %19 = vector.broadcast %18 : vector<16x1xf32> to vector<16x32xf32>
    %20 = arith.mulf %10, %19 : vector<16x32xf32>
    %21 = vector.broadcast %3 : vector<1x32xf32> to vector<16x32xf32>
    %22 = arith.mulf %21, %20 : vector<16x32xf32>
    %23 = vector.broadcast %4 : vector<1x32xf32> to vector<16x32xf32>
    %24 = arith.addf %22, %23 : vector<16x32xf32>
    %c0_11 = arith.constant 0 : index
    %c0_12 = arith.constant 0 : index
    %25 = vector.load %arg5[%c0_11, %c0_12] : memref<16x32xf32, #tpu.memory_space<vmem>>, vector<16x32xf32>
    tpu.vector_store %arg5[%c0_11, %c0_12], %24 {strides = array<i32>} : memref<16x32xf32, #tpu.memory_space<vmem>>, vector<16x32xf32>,
    return
  }
  func.func @transform_0(%arg0: i32) -> (i32, i32) {
    %c0_i32 = arith.constant 0 : i32
    %c0_i32_0 = arith.constant 0 : i32
    return %arg0, %c0_i32 : i32, i32
  }
  func.func @transform_1(%arg0: i32) -> (i32, i32) {
    %c0_i32 = arith.constant 0 : i32
    %c0_i32_0 = arith.constant 0 : i32
    return %arg0, %c0_i32 : i32, i32
  }
  func.func @transform_2(%arg0: i32) -> (i32, i32) {
    %c0_i32 = arith.constant 0 : i32
    %c0_i32_0 = arith.constant 0 : i32
    %c0_i32_1 = arith.constant 0 : i32
    return %c0_i32, %c0_i32_0 : i32, i32
  }
  func.func @transform_3(%arg0: i32) -> (i32, i32) {
    %c0_i32 = arith.constant 0 : i32
    %c0_i32_0 = arith.constant 0 : i32
    %c0_i32_1 = arith.constant 0 : i32
    return %c0_i32, %c0_i32_0 : i32, i32
  }
  func.func @transform_4(%arg0: i32) -> (i32, i32) {
    %c0_i32 = arith.constant 0 : i32
    %c0_i32_0 = arith.constant 0 : i32
    return %arg0, %c0_i32 : i32, i32
  }
}

</mosaic_0001>

<bundles_post_ra>
// kernel: transformer_forward_pallas.18
= control target key start
LH: loop header
LB: loop body
LE: loop exit
PB: predicated region body
PF: predicated region fallthrough
CT: control target
= control target key end

     0   :  { %vm18_vm0 = vcmask 261120   ;;  %s118_s0 = inlined_call_operand.vmem [shape: f32[16,32], index: 0, kind: input, shape index: {}]   ;;  %s119_s1 = inlined_call_operand.vmem [shape: f32[1,32], index: 1, kind: input, shape index: {}]   ;;  %s120_s2 = inlined_call_operand.vmem [shape: f32[1,32], index: 2, kind: input, shape index: {}]   ;;  %s121_s3 = inlined_call_operand.vmem [shape: f32[16,32], index: 3, kind: output, shape index: {}]  }
   0x1   :  { %v14_v0 = vld [vmem:[%s118_s0] sm:$0xff]  ;;  %v15_v1 = vld [vmem:[%s118_s0 + $0x8] sm:$0xff] }
   0x2   :  { %v19_v2 = vsel %vm18_vm0, %v14_v0, 0.0  ;;  %v22_v3 = vsel %vm18_vm0, %v15_v1, 0.0  ;;  %v68_v21 = vld [vmem:[%s119_s1] ss:$0 sm:$0xff] }
   0x3   :  { %20 = vadd.xlane.f32.xlu0 %v19_v2  ;;  %v69_v23 = vld [vmem:[%s120_s2] ss:$0 sm:$0xff] }
   0x7   :  { %23 = vadd.xlane.f32.xlu0 %v22_v3 }
  0x8c   :  { %v21_v4 = vpop.xlane.xlu0 %20 }
  0x8d   :  { %v26_v5 = vmul.f32 0.03125, %v21_v4 }
  0x8f   :  { %v28_v6 = vsub.f32 %v14_v0, %v26_v5 }
  0x90   :  { %v24_v7 = vpop.xlane.xlu0 %23 }
  0x91   :  { %v27_v8 = vmul.f32 0.03125, %v24_v7  ;;  %v30_v9 = vmul.f32 %v28_v6, %v28_v6 }
  0x93   :  { %v29_v10 = vsub.f32 %v15_v1, %v27_v8  ;;  %v32_v11 = vsel %vm18_vm0, %v30_v9, 0.0 }
  0x94   :  { %33 = vadd.xlane.f32.xlu1 %v32_v11 }
  0x95   :  { %v31_v12 = vmul.f32 %v29_v10, %v29_v10 }
  0x97   :  { %v35_v13 = vsel %vm18_vm0, %v31_v12, 0.0 }
  0x98   :  { %36 = vadd.xlane.f32.xlu1 %v35_v13 }
 0x11d   :  { %v34_v14 = vpop.xlane.xlu1 %33 }
 0x11e   :  { %v38_v15 = vmul.f32 0.03125, %v34_v14 }
 0x120   :  { %v40_v16 = vadd.f32 1e-12, %v38_v15 }
 0x121   :  { %v37_v17 = vpop.xlane.xlu1 %36 }
 0x122   :  { %70 = vrsqrt.f32 %v40_v16  ;;  %v39_v18 = vmul.f32 0.03125, %v37_v17 }
 0x124   :  { %v41_v19 = vadd.f32 1e-12, %v39_v18 }
 0x126   :  { %72 = vrsqrt.f32 %v41_v19 }
 0x12f   :  { %v71_v20 = vpop.eup %70 }
 0x130   :  { %v44_v22 = vmul.f32 %v71_v20, %v28_v6 }
 0x132   :  { %v52_v24 = vmul.f32 %v68_v21, %v44_v22 }
 0x133   :  { %v73_v25 = vpop.eup %72 }
 0x134   :  { %v60_v26 = vadd.f32 %v69_v23, %v52_v24  ;;  %v45_v27 = vmul.f32 %v73_v25, %v29_v10 }
 0x136   :  { %62 = vst.msk [vmem:[%s121_s3] sm:$0xff] %vm18_vm0, %v60_v26  ;;  %v53_v28 = vmul.f32 %v68_v21, %v45_v27 }
 0x138   :  { %v61_v29 = vadd.f32 %v69_v23, %v53_v28 }
 0x13a   :  { %63 = vst.msk [vmem:[%s121_s3 + $0x8] sm:$0xff] %vm18_vm0, %v61_v29 }

// kernel: transformer_forward_pallas.17
= control target key start
LH: loop header
LB: loop body
LE: loop exit
PB: predicated region body
PF: predicated region fallthrough
CT: control target
= control target key end

     0   :  { %8 = vsyncpa [#allocation3], 0  ;;  %s235_s0 = inlined_call_operand.hbm [shape: f32[16,24], index: 0, kind: input, shape index: {}]   ;;  %s236_s1 = inlined_call_operand.hbm [shape: bf16[24,32], index: 1, kind: input, shape index: {}]   ;;  %s237_s2 = inlined_call_operand.vmem [shape: f32[1,32], index: 2, kind: input, shape index: {}]   ;;  %s238_s3 = inlined_call_operand.vmem [shape: f32[16,32], index: 3, kind: output, shape index: {}]  }
   0x1   :  { %9 = vsyncpa [#allocation5], 0  ;;  %s192_s12 = smov [#allocation2]  }
   0x2   :  { %s15_s13 = sshll.u32 %s192_s12, 4  ;;  %s16_s13 = int_to_ptr.vmem [resolvable:$true] %s15_s13 }
   0x3   :  { %s156_s14 = scalar_lea.vmem %s16_s13, 256  ;;  %p161_p1 = scmp.lt.s32.totalorder %s16_s13, %s16_s13 }
   0x4   :  { %p157_p0 = scmp.ne.s32.totalorder %s16_s13, %s156_s14  ;;  %p162_p2 = scmp.lt.s32.totalorder %s156_s14, %s156_s14 }
   0x6   :  { %p163_p3 = por %p162_p2, %p161_p1 }
   0x8   :  { %p164_p4 = pnand %p163_p3, %p157_p0 }
   0xa   :  { %167 = shalt.err (!%p164_p4)
}
   0xb   :  { %s193_s15 = smov 128   ;;  %s194_s16 = smov 8  }
   0xc   :  { %21 = dma.hbm_to_vmem [thread:$0]  %s235_s0, 256, %s16_s13, [#allocation3], %s193_s15, %s193_s15, %s194_s16  }
   0xd   :  { %s195_s19 = smov [#allocation4]  }
   0xe   :  { %s27_s20 = sshll.u32 %s195_s19, 4  ;;  %s28_s20 = int_to_ptr.vmem [resolvable:$true] %s27_s20 }
   0xf   :  { %s176_s21 = scalar_lea.vmem %s28_s20, 192  ;;  %p181_p6 = scmp.lt.s32.totalorder %s28_s20, %s28_s20 }
  0x10   :  { %p177_p5 = scmp.ne.s32.totalorder %s28_s20, %s176_s21  ;;  %p182_p7 = scmp.lt.s32.totalorder %s176_s21, %s176_s21 }
  0x12   :  { %p183_p8 = por %p182_p7, %p181_p6 }
  0x14   :  { %p184_p9 = pnand %p183_p8, %p177_p5 }
  0x16   :  { %187 = shalt.err (!%p184_p9)
}
  0x17   :  { %s196_s22 = smov 64   ;;  %s197_s23 = smov 4  }
  0x18   :  { %33 = dma.hbm_to_vmem [thread:$0]  %s236_s1, 192, %s28_s20, [#allocation5], %s196_s22, %s196_s22, %s197_s23  }
  0x19   :  { %188 = dma.done.wait [#allocation3], 256  }
  0x1a   :  { %189 = vsyncadd [#allocation3], 4294967040 }
  0x1b   :  { %190 = dma.done.wait [#allocation5], 192  }
  0x1c   :  { %191 = vsyncadd [#allocation5], 4294967104  ;;  %v198_v0 = vmov 0.0   ;;  %vm199_vm0 = vmmov 0   ;;  %vm69_vm1 = vcmask 1043456   ;;  %v147_v3 = vld [vmem:[#allocation4] sm:$0xff]  }
  0x1d   :  { %130 = vmatprep.subr.bf16.mxu0 %v198_v0  ;;  %134 = vmatprep.mubr.msk.bf16.mxu0 %vm199_vm0, %v198_v0  ;;  %v146_v1 = vld [vmem:[#allocation4 + $0x8] ss:$0 sps:$4 sm:$0xff]   ;;  %v43_v4 = vld [vmem:[#allocation2] sm:$0xff]  ;;  %v44_v5 = vld [vmem:[#allocation2 + $0x8] sm:$0xff]  ;;  %vm65_vm2 = vcmask 195584   ;;  %vm114_vm3 = vcmask 261120  }
  0x1e   :  { %v71_v2 = vsel %vm69_vm1, %v146_v1, 0  ;;  %v45_v6 = vpack.c.bf16 %v44_v5, %v43_v4  ;;  %v123_v7 = vld [vmem:[%s237_s2] ss:$0 sm:$0xff] }
  0x1f   :  { %131 = vmatpush3.bf16.msra.mxu0 %v71_v2 }
  0x20   :  { %132 = vmatprep.subr.bf16.mxu0 %v198_v0 }
  0x23   :  { %133 = vmatpush3.bf16.msra.mxu0 %v147_v3 }
  0x26   :  { %135 = vmatmul.mubr.msk.bf16.vlgmr.msra.gmra.mxu0 %vm65_vm2, %v45_v6 }
  0xe6   :  { %v107_v8 = vpop.f32.mrf.mxu0 }
  0xe7   :  { %v108_v9 = vadd.f32 %v123_v7, %v107_v8 }
  0xe8   :  { %v136_v10 = vpop.f32.mrf.mxu0 }
  0xe9   :  { %115 = vst.msk [vmem:[%s238_s3] sm:$0xff] %vm114_vm3, %v108_v9 }
  0xea   :  { %v110_v11 = vpop.f32.mrf.mxu0 }
  0xeb   :  { %v111_v12 = vadd.f32 %v123_v7, %v110_v11 }
  0xec   :  { %v137_v13 = vpop.f32.mrf.mxu0 }
  0xed   :  { %116 = vst.msk [vmem:[%s238_s3 + $0x8] sm:$0xff] %vm114_vm3, %v111_v12 }
  0xee   :  { %121 = vsyncpa [#allocation3], 1 }
  0xef   :  { %122 = vsyncpa [#allocation5], 1 }

// kernel: transformer_forward_pallas.20
= control target key start
LH: loop header
LB: loop body
LE: loop exit
PB: predicated region body
PF: predicated region fallthrough
CT: control target
= control target key end

     0   :  { %v112_v0 = vmov 0.0   ;;  %vm113_vm0 = vmmov 0   ;;  %vm41_vm1 = vcmask 261120   ;;  %vm86_vm2 = vcmask 785408   ;;  %s155_s1 = inlined_call_operand.vmem [shape: bf16[32,96], index: 1, kind: input, shape index: {}]   ;;  %s156_s0 = inlined_call_operand.vmem [shape: f32[16,32], index: 0, kind: input, shape index: {}]   ;;  %s157_s2 = inlined_call_operand.vmem [shape: f32[1,96], index: 2, kind: input, shape index: {}]   ;;  %s158_s3 = inlined_call_operand.vmem [shape: f32[16,96], index: 3, kind: output, shape index: {}]  }
   0x1   :  { %100 = vmatprep.subr.bf16.mxu0 %v112_v0  ;;  %v110_v1 = vld [vmem:[%s155_s1 + $0x8] sm:$0xff]   ;;  %104 = vmatprep.mubr.msk.bf16.mxu0 %vm113_vm0, %v112_v0  ;;  %v111_v2 = vld [vmem:[%s155_s1] sm:$0xff]  }
   0x2   :  { %101 = vmatpush3.bf16.msra.mxu0 %v110_v1  ;;  %v15_v3 = vld [vmem:[%s156_s0] sm:$0xff]  ;;  %v16_v4 = vld [vmem:[%s156_s0 + $0x8] sm:$0xff] }
   0x3   :  { %102 = vmatprep.subr.bf16.mxu0 %v112_v0  ;;  %v17_v5 = vpack.c.bf16 %v16_v4, %v15_v3  ;;  %v93_v6 = vld [vmem:[%s157_s2] ss:$0 sm:$0xff] }
   0x6   :  { %103 = vmatpush3.bf16.msra.mxu0 %v111_v2 }
   0x9   :  { %105 = vmatmul.mubr.msk.bf16.vlgmr.msra.gmra.mxu0 %vm41_vm1, %v17_v5 }
  0xc9   :  { %v79_v7 = vpop.f32.mrf.mxu0 }
  0xca   :  { %v80_v8 = vadd.f32 %v93_v6, %v79_v7 }
  0xcb   :  { %v106_v9 = vpop.f32.mrf.mxu0 }
  0xcc   :  { %87 = vst.msk [vmem:[%s158_s3] sm:$0xff] %vm86_vm2, %v80_v8 }
  0xcd   :  { %v82_v10 = vpop.f32.mrf.mxu0 }
  0xce   :  { %v83_v11 = vadd.f32 %v93_v6, %v82_v10 }
  0xcf   :  { %v107_v12 = vpop.f32.mrf.mxu0 }
  0xd0   :  { %88 = vst.msk [vmem:[%s158_s3 + $0x8] sm:$0xff] %vm86_vm2, %v83_v11 }

// kernel: transformer_forward_pallas.19
= control target key start
LH: loop header
LB: loop body
LE: loop exit
PB: predicated region body
PF: predicated region fallthrough
CT: control target
= control target key end

     0   :  { %vm25_vm0 = vcmask 261120   ;;  %s136_s0 = inlined_call_operand.vmem [shape: f32[16,32], index: 0, kind: input, shape index: {}]   ;;  %s137_s1 = inlined_call_operand.vmem [shape: f32[16,32], index: 1, kind: input, shape index: {}]   ;;  %s138_s2 = inlined_call_operand.vmem [shape: f32[1,32], index: 2, kind: input, shape index: {}]   ;;  %s139_s3 = inlined_call_operand.vmem [shape: f32[1,32], index: 3, kind: input, shape index: {}]   ;;  %s140_s4 = inlined_call_operand.vmem [shape: f32[16,32], index: 4, kind: output, shape index: {}]  }
   0x1   :  { %v17_v0 = vld [vmem:[%s136_s0] sm:$0xff]  ;;  %v18_v2 = vld [vmem:[%s136_s0 + $0x8] sm:$0xff] }
   0x2   :  { %v19_v1 = vld [vmem:[%s137_s1] sm:$0xff]  ;;  %v20_v4 = vld [vmem:[%s137_s1 + $0x8] sm:$0xff] }
   0x3   :  { %v21_v3 = vadd.f32 %v19_v1, %v17_v0  ;;  %v22_v5 = vadd.f32 %v20_v4, %v18_v2  ;;  %v75_v25 = vld [vmem:[%s138_s2] ss:$0 sm:$0xff] }
   0x4   :  { %v76_v27 = vld [vmem:[%s139_s3] ss:$0 sm:$0xff] }
   0x5   :  { %v26_v6 = vsel %vm25_vm0, %v21_v3, 0.0  ;;  %v29_v7 = vsel %vm25_vm0, %v22_v5, 0.0 }
   0x6   :  { %27 = vadd.xlane.f32.xlu0 %v26_v6 }
   0xa   :  { %30 = vadd.xlane.f32.xlu0 %v29_v7 }
  0x8f   :  { %v28_v8 = vpop.xlane.xlu0 %27 }
  0x90   :  { %v33_v9 = vmul.f32 0.03125, %v28_v8 }
  0x92   :  { %v35_v10 = vsub.f32 %v21_v3, %v33_v9 }
  0x93   :  { %v31_v11 = vpop.xlane.xlu0 %30 }
  0x94   :  { %v34_v12 = vmul.f32 0.03125, %v31_v11  ;;  %v37_v13 = vmul.f32 %v35_v10, %v35_v10 }
  0x96   :  { %v36_v14 = vsub.f32 %v22_v5, %v34_v12  ;;  %v39_v15 = vsel %vm25_vm0, %v37_v13, 0.0 }
  0x97   :  { %40 = vadd.xlane.f32.xlu1 %v39_v15 }
  0x98   :  { %v38_v16 = vmul.f32 %v36_v14, %v36_v14 }
  0x9a   :  { %v42_v17 = vsel %vm25_vm0, %v38_v16, 0.0 }
  0x9b   :  { %43 = vadd.xlane.f32.xlu1 %v42_v17 }
 0x120   :  { %v41_v18 = vpop.xlane.xlu1 %40 }
 0x121   :  { %v45_v19 = vmul.f32 0.03125, %v41_v18 }
 0x123   :  { %v47_v20 = vadd.f32 1e-12, %v45_v19 }
 0x124   :  { %v44_v21 = vpop.xlane.xlu1 %43 }
 0x125   :  { %77 = vrsqrt.f32 %v47_v20  ;;  %v46_v22 = vmul.f32 0.03125, %v44_v21 }
 0x127   :  { %v48_v23 = vadd.f32 1e-12, %v46_v22 }
 0x129   :  { %79 = vrsqrt.f32 %v48_v23 }
 0x132   :  { %v78_v24 = vpop.eup %77 }
 0x133   :  { %v51_v26 = vmul.f32 %v78_v24, %v35_v10 }
 0x135   :  { %v59_v28 = vmul.f32 %v75_v25, %v51_v26 }
 0x136   :  { %v80_v29 = vpop.eup %79 }
 0x137   :  { %v67_v30 = vadd.f32 %v76_v27, %v59_v28  ;;  %v52_v31 = vmul.f32 %v80_v29, %v36_v14 }
 0x139   :  { %69 = vst.msk [vmem:[%s140_s4] sm:$0xff] %vm25_vm0, %v67_v30  ;;  %v60_v32 = vmul.f32 %v75_v25, %v52_v31 }
 0x13b   :  { %v68_v33 = vadd.f32 %v76_v27, %v60_v32 }
 0x13d   :  { %70 = vst.msk [vmem:[%s140_s4 + $0x8] sm:$0xff] %vm25_vm0, %v68_v33 }

// kernel: transformer_forward_pallas.22
= control target key start
LH: loop header
LB: loop body
LE: loop exit
PB: predicated region body
PF: predicated region fallthrough
CT: control target
= control target key end

     0   :  { %v111_v0 = vmov 0.0   ;;  %vm112_vm0 = vmmov 0   ;;  %vm41_vm1 = vcmask 261120   ;;  %s154_s1 = inlined_call_operand.vmem [shape: bf16[32,32], index: 1, kind: input, shape index: {}]   ;;  %s155_s0 = inlined_call_operand.vmem [shape: f32[16,32], index: 0, kind: input, shape index: {}]   ;;  %s156_s2 = inlined_call_operand.vmem [shape: f32[1,32], index: 2, kind: input, shape index: {}]   ;;  %s157_s3 = inlined_call_operand.vmem [shape: f32[16,32], index: 3, kind: output, shape index: {}]  }
   0x1   :  { %99 = vmatprep.subr.bf16.mxu0 %v111_v0  ;;  %v109_v1 = vld [vmem:[%s154_s1 + $0x8] sm:$0xff]   ;;  %103 = vmatprep.mubr.msk.bf16.mxu0 %vm112_vm0, %v111_v0  ;;  %v110_v2 = vld [vmem:[%s154_s1] sm:$0xff]  }
   0x2   :  { %100 = vmatpush3.bf16.msra.mxu0 %v109_v1  ;;  %v15_v3 = vld [vmem:[%s155_s0] sm:$0xff]  ;;  %v16_v4 = vld [vmem:[%s155_s0 + $0x8] sm:$0xff] }
   0x3   :  { %101 = vmatprep.subr.bf16.mxu0 %v111_v0  ;;  %v17_v5 = vpack.c.bf16 %v16_v4, %v15_v3  ;;  %v92_v6 = vld [vmem:[%s156_s2] ss:$0 sm:$0xff] }
   0x6   :  { %102 = vmatpush3.bf16.msra.mxu0 %v110_v2 }
   0x9   :  { %104 = vmatmul.mubr.msk.bf16.vlgmr.msra.gmra.mxu0 %vm41_vm1, %v17_v5 }
  0xc9   :  { %v79_v7 = vpop.f32.mrf.mxu0 }
  0xca   :  { %v80_v8 = vadd.f32 %v92_v6, %v79_v7 }
  0xcb   :  { %v105_v9 = vpop.f32.mrf.mxu0 }
  0xcc   :  { %86 = vst.msk [vmem:[%s157_s3] sm:$0xff] %vm41_vm1, %v80_v8 }
  0xcd   :  { %v82_v10 = vpop.f32.mrf.mxu0 }
  0xce   :  { %v83_v11 = vadd.f32 %v92_v6, %v82_v10 }
  0xcf   :  { %v106_v12 = vpop.f32.mrf.mxu0 }
  0xd0   :  { %87 = vst.msk [vmem:[%s157_s3 + $0x8] sm:$0xff] %vm41_vm1, %v83_v11 }

// kernel: transformer_forward_pallas.25
= control target key start
LH: loop header
LB: loop body
LE: loop exit
PB: predicated region body
PF: predicated region fallthrough
CT: control target
= control target key end

     0   :  { %v138_v0 = vmov 0.0   ;;  %vm139_vm0 = vmmov 0   ;;  %vm57_vm1 = vcmask 523264   ;;  %vm102_vm2 = vcmask 261120   ;;  %s187_s1 = inlined_call_operand.vmem [shape: bf16[64,32], index: 1, kind: input, shape index: {}]   ;;  %s188_s0 = inlined_call_operand.vmem [shape: f32[16,64], index: 0, kind: input, shape index: {}]   ;;  %s189_s2 = inlined_call_operand.vmem [shape: f32[1,32], index: 2, kind: input, shape index: {}]   ;;  %s190_s3 = inlined_call_operand.vmem [shape: f32[16,32], index: 3, kind: output, shape index: {}]  }
   0x1   :  { %120 = vmatprep.subr.bf16.mxu0 %v138_v0  ;;  %v134_v1 = vld [vmem:[%s187_s1 + $0x18] sm:$0xff]   ;;  %128 = vmatprep.mubr.msk.bf16.mxu0 %vm139_vm0, %v138_v0  ;;  %v135_v2 = vld [vmem:[%s187_s1 + $0x10] sm:$0xff]   ;;  %v136_v3 = vld [vmem:[%s187_s1 + $0x8] sm:$0xff]  }
   0x2   :  { %121 = vmatpush3.bf16.msra.mxu0 %v134_v1  ;;  %v137_v4 = vld [vmem:[%s187_s1] sm:$0xff]   ;;  %v16_v6 = vld [vmem:[%s188_s0 + $0x8] sm:$0xff] }
   0x3   :  { %122 = vmatprep.subr.bf16.mxu0 %v138_v0  ;;  %v15_v5 = vld [vmem:[%s188_s0] sm:$0xff] }
   0x4   :  { %v17_v7 = vpack.c.bf16 %v16_v6, %v15_v5  ;;  %v109_v8 = vld [vmem:[%s189_s2] ss:$0 sm:$0xff] }
   0x6   :  { %123 = vmatpush3.bf16.msra.mxu0 %v135_v2 }
   0x7   :  { %124 = vmatprep.subr.bf16.mxu0 %v138_v0 }
   0xa   :  { %125 = vmatpush3.bf16.msra.mxu0 %v136_v3 }
   0xb   :  { %126 = vmatprep.subr.bf16.mxu0 %v138_v0 }
   0xe   :  { %127 = vmatpush3.bf16.msra.mxu0 %v137_v4 }
  0x11   :  { %129 = vmatmul.mubr.msk.bf16.vlgmr.msra.gmra.mxu0 %vm57_vm1, %v17_v7 }
  0xd1   :  { %v95_v9 = vpop.f32.mrf.mxu0 }
  0xd2   :  { %v96_v10 = vadd.f32 %v109_v8, %v95_v9 }
  0xd3   :  { %v130_v11 = vpop.f32.mrf.mxu0 }
  0xd4   :  { %103 = vst.msk [vmem:[%s190_s3] sm:$0xff] %vm102_vm2, %v96_v10 }
  0xd5   :  { %v98_v12 = vpop.f32.mrf.mxu0 }
  0xd6   :  { %v99_v13 = vadd.f32 %v109_v8, %v98_v12 }
  0xd7   :  { %v131_v14 = vpop.f32.mrf.mxu0 }
  0xd8   :  { %104 = vst.msk [vmem:[%s190_s3 + $0x8] sm:$0xff] %vm102_vm2, %v99_v13 }

// kernel: transformer_forward_pallas.24
= control target key start
LH: loop header
LB: loop body
LE: loop exit
PB: predicated region body
PF: predicated region fallthrough
CT: control target
= control target key end

     0   :  { %v175_v0 = vmov 0.0   ;;  %vm176_vm0 = vmmov 0   ;;  %vm41_vm1 = vcmask 261120   ;;  %v177_v51 = vmov -1.0   ;;  %s219_s1 = inlined_call_operand.vmem [shape: bf16[32,64], index: 1, kind: input, shape index: {}]   ;;  %s220_s0 = inlined_call_operand.vmem [shape: f32[16,32], index: 0, kind: input, shape index: {}]   ;;  %s221_s2 = inlined_call_operand.vmem [shape: f32[1,64], index: 2, kind: input, shape index: {}]   ;;  %s222_s3 = inlined_call_operand.vmem [shape: f32[16,64], index: 3, kind: output, shape index: {}]  }
   0x1   :  { %154 = vmatprep.subr.bf16.mxu0 %v175_v0  ;;  %v165_v1 = vld [vmem:[%s219_s1 + $0x8] sm:$0xff]   ;;  %158 = vmatprep.mubr.msk.bf16.mxu0 %vm176_vm0, %v175_v0  ;;  %v166_v2 = vld [vmem:[%s219_s1] sm:$0xff]   ;;  %vm140_vm4 = vcmask 523264  }
   0x2   :  { %155 = vmatpush3.bf16.msra.mxu0 %v165_v1  ;;  %v15_v3 = vld [vmem:[%s220_s0] sm:$0xff]  ;;  %v16_v4 = vld [vmem:[%s220_s0 + $0x8] sm:$0xff] }
   0x3   :  { %156 = vmatprep.subr.bf16.mxu0 %v175_v0  ;;  %v17_v5 = vpack.c.bf16 %v16_v4, %v15_v3  ;;  %v147_v6 = vld [vmem:[%s221_s2] ss:$0 sm:$0xff] }
   0x6   :  { %157 = vmatpush3.bf16.msra.mxu0 %v166_v2 }
   0x9   :  { %159 = vmatmul.mubr.msk.bf16.vlgmr.msra.gmra.mxu0 %vm41_vm1, %v17_v5 }
  0xc9   :  { %v79_v7 = vpop.f32.mrf.mxu0 }
  0xca   :  { %v80_v8 = vadd.f32 %v147_v6, %v79_v7 }
  0xcb   :  { %v160_v9 = vpop.f32.mrf.mxu0 }
  0xcc   :  { %v88_v10 = vmul.f32 0.70710677, %v80_v8  ;;  %v86_v55 = vmul.f32 0.5, %v80_v8 }
  0xcd   :  { %v82_v11 = vpop.f32.mrf.mxu0 }
  0xce   :  { %v94_v12 = vand.u32 2147483647, %v88_v10  ;;  %v83_v13 = vadd.f32 %v147_v6, %v82_v11  ;;  %vm90_vm2 = vcmp.ge.f32.partialorder %v88_v10, 0.0 }
  0xcf   :  { %v161_v14 = vpop.f32.mrf.mxu0  ;;  %v92_v52 = vsel %vm90_vm2, 1.0, %v177_v51 }
  0xd0   :  { %v96_v15 = vmul.f32 0.3275911, %v94_v12  ;;  %v89_v16 = vmul.f32 0.70710677, %v83_v13  ;;  %v122_v21 = vsub.f32 0.0, %v94_v12  ;;  %v87_v61 = vmul.f32 0.5, %v83_v13 }
  0xd2   :  { %v98_v17 = vadd.f32 1.0, %v96_v15  ;;  %v95_v18 = vand.u32 2147483647, %v89_v16  ;;  %v124_v22 = vmul.f32 %v122_v21, %v94_v12  ;;  %vm91_vm3 = vcmp.ge.f32.partialorder %v89_v16, 0.0 }
  0xd3   :  { %v93_v58 = vsel %vm91_vm3, 1.0, %v177_v51 }
  0xd4   :  { %167 = vrcp.f32 %v98_v17  ;;  %v97_v19 = vmul.f32 0.3275911, %v95_v18  ;;  %v123_v23 = vsub.f32 0.0, %v95_v18  ;;  %v126_v26 = vmul.f32 1.442695, %v124_v22 }
  0xd6   :  { %v99_v20 = vadd.f32 1.0, %v97_v19  ;;  %v125_v27 = vmul.f32 %v123_v23, %v95_v18 }
  0xd8   :  { %169 = vrcp.f32 %v99_v20  ;;  %v128_v32 = vmul.f32 1.442695, %v125_v27 }
  0xd9   :  { %171 = vpow2.f32 %v126_v26 }
  0xda   :  { %173 = vpow2.f32 %v128_v32 }
  0xe1   :  { %v168_v24 = vpop.eup %167 }
  0xe2   :  { %v104_v25 = vmul.f32 1.0614054, %v168_v24 }
  0xe4   :  { %v106_v28 = vadd.f32 -1.4531521, %v104_v25 }
  0xe5   :  { %v170_v29 = vpop.eup %169 }
  0xe6   :  { %v108_v30 = vmul.f32 %v168_v24, %v106_v28  ;;  %v105_v31 = vmul.f32 1.0614054, %v170_v29  ;;  %v172_v45 = vpop.eup %171 }
  0xe7   :  { %v174_v50 = vpop.eup %173 }
  0xe8   :  { %v110_v33 = vadd.f32 1.4214138, %v108_v30  ;;  %v107_v34 = vadd.f32 -1.4531521, %v105_v31 }
  0xea   :  { %v112_v35 = vmul.f32 %v168_v24, %v110_v33  ;;  %v109_v36 = vmul.f32 %v170_v29, %v107_v34 }
  0xec   :  { %v114_v37 = vadd.f32 -0.28449672, %v112_v35  ;;  %v111_v38 = vadd.f32 1.4214138, %v109_v36 }
  0xee   :  { %v116_v39 = vmul.f32 %v168_v24, %v114_v37  ;;  %v113_v40 = vmul.f32 %v170_v29, %v111_v38 }
  0xf0   :  { %v118_v41 = vadd.f32 0.2548296, %v116_v39  ;;  %v115_v42 = vadd.f32 -0.28449672, %v113_v40 }
  0xf2   :  { %v120_v43 = vmul.f32 %v168_v24, %v118_v41  ;;  %v117_v44 = vmul.f32 %v170_v29, %v115_v42 }
  0xf4   :  { %v130_v46 = vmul.f32 %v172_v45, %v120_v43  ;;  %v119_v47 = vadd.f32 0.2548296, %v117_v44 }
  0xf6   :  { %v132_v48 = vsub.f32 1.0, %v130_v46  ;;  %v121_v49 = vmul.f32 %v170_v29, %v119_v47 }
  0xf8   :  { %v134_v53 = vmul.f32 %v132_v48, %v92_v52  ;;  %v131_v54 = vmul.f32 %v174_v50, %v121_v49 }
  0xfa   :  { %v136_v56 = vadd.f32 1.0, %v134_v53  ;;  %v133_v57 = vsub.f32 1.0, %v131_v54 }
  0xfc   :  { %v138_v59 = vmul.f32 %v136_v56, %v86_v55  ;;  %v135_v60 = vmul.f32 %v133_v57, %v93_v58 }
  0xfe   :  { %141 = vst.msk [vmem:[%s222_s3] sm:$0xff] %vm140_vm4, %v138_v59  ;;  %v137_v62 = vadd.f32 1.0, %v135_v60 }
 0x100   :  { %v139_v63 = vmul.f32 %v137_v62, %v87_v61 }
 0x102   :  { %142 = vst.msk [vmem:[%s222_s3 + $0x8] sm:$0xff] %vm140_vm4, %v139_v63 }

// kernel: transformer_forward_pallas.21
= control target key start
LH: loop header
LB: loop body
LE: loop exit
PB: predicated region body
PF: predicated region fallthrough
CT: control target
= control target key end

     0   :  { %s515_s12 = smov 0   ;;  %s550_s0 = inlined_call_operand.vmem [shape: f32[8,8,8], index: 0, kind: input, shape index: {}]   ;;  %s551_s1 = inlined_call_operand.vmem [shape: f32[8,8,8], index: 1, kind: input, shape index: {}]   ;;  %s552_s2 = inlined_call_operand.vmem [shape: f32[8,8,8], index: 2, kind: input, shape index: {}]   ;;  %s553_s3 = inlined_call_operand.vmem [shape: f32[8,8,8], index: 3, kind: output, shape index: {}]  }
   0x1 LB: > { %s443_s13 = sadd.s32 4294967295, %s491_s12   ;;  %p447_p0 = scmp.ge.s32.totalorder %s491_s12, 1  ;;  %s491_s12 = sphi %s515_s12, %s13_s12  }
   0x2   : > { %p154_p1 = scmp.lt.s32.totalorder %s491_s12, 9 }
   0x4   : > { %p155_p2 = pnand %p447_p0, %p154_p1 }
   0x5   : > { %p184_p3 = scmp.lt.s32.totalorder (!%p155_p2), %s443_s13, 7 }
   0x6   : > { %158 = sbr.rel (%p155_p2) target bundleno = 720 (0x2d0), region = 32 }
   0xb   : > { %v493_v0 = vmov 0.0   ;;  %vm494_vm0 = vmmov 0   ;;  %s555_s13 = smov (!%p184_p3, %s443_s13), 7  ;;  %vm203_vm1 = vcmask 64512  }
   0xc   : > { %461 = vmatprep.subr.mxu0 %v493_v0  ;;  %463 = vmatprep.mubr.msk.f32.mxu0 %vm494_vm0, %v493_v0  ;;  %s523_s14 = sshll.u32 %s555_s13, 3 }
   0xd   : > { %466 = vmatprep.subr.mxu1 %v493_v0  ;;  %468 = vmatprep.mubr.msk.f32.mxu1 %vm494_vm0, %v493_v0  ;;  %s191_s17 = scalar_lea.vmem %s551_s1, %s523_s14  ;;  %s187_s20 = scalar_lea.vmem %s550_s0, %s523_s14 }
   0xe   : > { %v201_v1 = vld [vmem:[%s191_s17] sm:$0xff]  ;;  %s195_s23 = scalar_lea.vmem %s552_s2, %s523_s14  ;;  %s199_s26 = scalar_lea.vmem %s553_s3, %s523_s14 }
   0xf   : > { %462 = vmatpush3.xpose.msk.msra.mxu0 %vm203_vm1, %v201_v1  ;;  %v200_v2 = vld [vmem:[%s187_s20] sm:$0xff] }
  0x10   : > { %v202_v12 = vld [vmem:[%s195_s23] sm:$0xff] }
  0x11   : > { %467 = vmatpush3.msra.mxu1 %v202_v12 }
  0x12   : > { %464 = vmatmul.mubr.msk.f32.vlgmr.msra.gmra.mxu0 %vm203_vm1, %v200_v2 }
  0xd2   : > { %v276_v3 = vpop.f32.mrf.mxu0 }
  0xd3   : > { %v280_v4 = vmul.f32 0.35355338, %v276_v3 }
  0xd4   : > { %v465_v5 = vpop.f32.mrf.mxu0 }
  0xd5   : > { %v281_v6 = vsel %vm203_vm1, %v280_v4, -inf }
  0xd6   : > { %282 = vmax.xlane.f32.xlu0 %v281_v6 }
 0x15f   : > { %v283_v7 = vpop.xlane.xlu0 %282 }
 0x160   : > { %v284_v8 = vsub.f32 %v280_v4, %v283_v7 }
 0x162   : > { %v285_v9 = vmul.f32 1.442695, %v284_v8 }
 0x164   : > { %481 = vpow2.f32 %v285_v9 }
 0x171   : > { %v482_v10 = vpop.eup %481 }
 0x172   : > { %v287_v11 = vsel %vm203_vm1, %v482_v10, 0.0 }
 0x173   : > { %288 = vadd.xlane.f32.xlu0 %v287_v11 }
 0x1fc   : > { %v289_v13 = vpop.xlane.xlu0 %288 }
 0x1fd   : > { %483 = vrcp.f32 %v289_v13 }
 0x20a   : > { %v484_v14 = vpop.eup %483 }
 0x20b   : > { %v291_v15 = vmul.f32 %v484_v14, %v482_v10 }
 0x20d   : > { %469 = vmatmul.mubr.msk.f32.vlgmr.msra.gmra.mxu1 %vm203_vm1, %v291_v15 }
 0x2cd   : > { %v361_v16 = vpop.f32.mrf.mxu1 }
 0x2ce   : > { %365 = vst.msk [vmem:[%s199_s26] sm:$0xff] %vm203_vm1, %v361_v16 }
 0x2cf   : > { %v470_v17 = vpop.f32.mrf.mxu1 }
 0x2d0 PF: > { %s13_s12 = sadd.s32 1, %s491_s12  }
 0x2d1   : > { %p10_p4 = scmp.ge.s32.totalorder %s13_s12, 10  }
 0x2d3   :  { %12 = sbr.rel (!%p10_p4) target bundleno = 1 (0x1), region = 68 }

// kernel: transformer_forward_pallas.33
= control target key start
LH: loop header
LB: loop body
LE: loop exit
PB: predicated region body
PF: predicated region fallthrough
CT: control target
= control target key end

     0   :  { %vm26_vm0 = vcmask 261120   ;;  %s174_s0 = inlined_call_operand.vmem [shape: f32[16,32], index: 0, kind: input, shape index: {}]   ;;  %s175_s1 = inlined_call_operand.vmem [shape: f32[16,32], index: 1, kind: input, shape index: {}]   ;;  %s176_s2 = inlined_call_operand.vmem [shape: f32[1,32], index: 2, kind: input, shape index: {}]   ;;  %s177_s3 = inlined_call_operand.vmem [shape: f32[1,32], index: 3, kind: input, shape index: {}]   ;;  %s178_s4 = inlined_call_operand.hbm [shape: f32[16,32], index: 4, kind: output, shape index: {}]  }
   0x1   :  { %v18_v0 = vld [vmem:[%s174_s0] sm:$0xff]  ;;  %v19_v2 = vld [vmem:[%s174_s0 + $0x8] sm:$0xff] }
   0x2   :  { %v20_v1 = vld [vmem:[%s175_s1] sm:$0xff]  ;;  %v21_v4 = vld [vmem:[%s175_s1 + $0x8] sm:$0xff] }
   0x3   :  { %v22_v3 = vadd.f32 %v20_v1, %v18_v0 }
   0x4   :  { %9 = vsyncpa [#allocation3], 0  ;;  %v23_v5 = vadd.f32 %v21_v4, %v19_v2  ;;  %v88_v25 = vld [vmem:[%s176_s2] ss:$0 sm:$0xff]  ;;  %s119_s25 = smov [#allocation2]  }
   0x5   :  { %v27_v6 = vsel %vm26_vm0, %v22_v3, 0.0  ;;  %v89_v27 = vld [vmem:[%s177_s3] ss:$0 sm:$0xff]  ;;  %s77_s26 = sshll.u32 %s119_s25, 4  ;;  %s78_s26 = int_to_ptr.vmem [resolvable:$true] %s77_s26 }
   0x6   :  { %28 = vadd.xlane.f32.xlu0 %v27_v6  ;;  %v30_v7 = vsel %vm26_vm0, %v23_v5, 0.0  ;;  %s97_s27 = scalar_lea.vmem %s78_s26, 256  ;;  %p102_p1 = scmp.lt.s32.totalorder %s78_s26, %s78_s26 }
   0x7   :  { %p98_p0 = scmp.ne.s32.totalorder %s78_s26, %s97_s27  ;;  %p103_p2 = scmp.lt.s32.totalorder %s97_s27, %s97_s27 }
   0x9   :  { %p104_p3 = por %p103_p2, %p102_p1 }
   0xa   :  { %31 = vadd.xlane.f32.xlu0 %v30_v7 }
   0xb   :  { %p105_p4 = pnand %p104_p3, %p98_p0 }
  0x8f   :  { %v29_v8 = vpop.xlane.xlu0 %28 }
  0x90   :  { %v34_v9 = vmul.f32 0.03125, %v29_v8 }
  0x92   :  { %v36_v10 = vsub.f32 %v22_v3, %v34_v9 }
  0x93   :  { %v32_v11 = vpop.xlane.xlu0 %31 }
  0x94   :  { %v35_v12 = vmul.f32 0.03125, %v32_v11  ;;  %v38_v13 = vmul.f32 %v36_v10, %v36_v10 }
  0x96   :  { %v37_v14 = vsub.f32 %v23_v5, %v35_v12  ;;  %v40_v15 = vsel %vm26_vm0, %v38_v13, 0.0 }
  0x97   :  { %41 = vadd.xlane.f32.xlu1 %v40_v15 }
  0x98   :  { %v39_v16 = vmul.f32 %v37_v14, %v37_v14 }
  0x9a   :  { %v43_v17 = vsel %vm26_vm0, %v39_v16, 0.0 }
  0x9b   :  { %44 = vadd.xlane.f32.xlu1 %v43_v17 }
 0x120   :  { %v42_v18 = vpop.xlane.xlu1 %41 }
 0x121   :  { %v46_v19 = vmul.f32 0.03125, %v42_v18 }
 0x123   :  { %v48_v20 = vadd.f32 1e-12, %v46_v19 }
 0x124   :  { %v45_v21 = vpop.xlane.xlu1 %44 }
 0x125   :  { %93 = vrsqrt.f32 %v48_v20  ;;  %v47_v22 = vmul.f32 0.03125, %v45_v21 }
 0x127   :  { %v49_v23 = vadd.f32 1e-12, %v47_v22 }
 0x129   :  { %95 = vrsqrt.f32 %v49_v23 }
 0x132   :  { %v94_v24 = vpop.eup %93 }
 0x133   :  { %v52_v26 = vmul.f32 %v94_v24, %v36_v10 }
 0x135   :  { %v60_v28 = vmul.f32 %v88_v25, %v52_v26 }
 0x136   :  { %v96_v29 = vpop.eup %95 }
 0x137   :  { %v53_v30 = vmul.f32 %v96_v29, %v37_v14  ;;  %v68_v31 = vadd.f32 %v89_v27, %v60_v28 }
 0x139   :  { %v61_v32 = vmul.f32 %v88_v25, %v53_v30  ;;  %70 = vst.msk [vmem:[#allocation2] sm:$0xff] %vm26_vm0, %v68_v31 }
 0x13b   :  { %v69_v33 = vadd.f32 %v89_v27, %v61_v32 }
 0x13d   :  { %71 = vst.msk [vmem:[#allocation2 + $0x8] sm:$0xff] %vm26_vm0, %v69_v33 }
 0x13e   :  { %108 = shalt.err (!%p105_p4)
}
 0x13f   :  { %s120_s2 = smov 128   ;;  %s121_s3 = smov 8  }
 0x140   :  { %83 = dma.vmem_to_hbm [thread:$0]  %s78_s26, 256, %s178_s4, [#allocation3], %s120_s2, %s120_s2, %s121_s3  }
 0x141   :  { %117 = dma.done.wait [#allocation3], 256  }
 0x142   :  { %118 = vsyncadd [#allocation3], 4294967040 }
 0x143   :  { %87 = vsyncpa [#allocation3], 1 }

</bundles_post_ra>
